<compile_context>
chip_gen: v7x
topology: tpu7x:2x2x1
jax: 0.10.0
libtpu: 0.0.40
codegen_flags: <defaults>
</compile_context>

<pallas_src>
import functools

import jax
import jax.numpy as jnp
from jax.experimental import pallas as pl
from jax.experimental.pallas import tpu as pltpu


def _eup_supports_bf16():
    """bf16 exp only where the EUP supports bf16 (v6e / v7x); f32 elsewhere."""
    try:
        kind = jax.devices()[0].device_kind.lower()
    except Exception:
        return False
    return any(tag in kind for tag in ("v6", "v7", "7x"))


def self_attn_kernel(x_ref, w_ref, b_ref, bv_ref, gamma_ref, out_ref,
                     q_sc, k_sc, hvT_sc, *, Ck, TQ, N_valid, exp_bf16):
    t = pl.program_id(1)
    Np = k_sc.shape[1]

    # Once per batch element (t == 0): single fused Q/K/(Wv*H) projection on the
    # MXU, cached in VMEM scratch in lane-dense layouts.
    @pl.when(t == 0)
    def _():
        x_bf = x_ref[...].astype(jnp.bfloat16)                                  # (C, Np)
        proj = jnp.dot(w_ref[...], x_bf,
                       preferred_element_type=jnp.float32) + b_ref[...]         # (2Ck+C, Np) f32
        q_sc[...] = proj[:Ck].astype(jnp.bfloat16)                              # (Ck, Np)
        k_sc[...] = proj[Ck:2 * Ck].astype(jnp.bfloat16)                        # (Ck, Np)
        hvT_sc[...] = proj[2 * Ck:].astype(jnp.bfloat16).T                      # (Np, C)

    toff = pl.multiple_of(t * TQ, TQ)

    # Scores for this query tile: transpose only the tiny (Ck, TQ) slice, then
    # bf16 MXU matmul with f32 accumulation -> (TQ, Np).
    q_t = q_sc[:, pl.ds(toff, TQ)]                                              # (Ck, TQ) bf16
    s = jnp.dot(q_t.T, k_sc[...], preferred_element_type=jnp.float32)           # (TQ, Np) f32

    if N_valid != Np:
        # Padded key columns must not contribute to the softmax (static branch).
        key_idx = jax.lax.broadcasted_iota(jnp.int32, s.shape, 1)
        s = jnp.where(key_idx < N_valid, s, -jnp.inf)

    # Softmax over keys; normalization deferred to after the P @ hv^T matmul.
    s_max = jnp.max(s, axis=-1, keepdims=True)
    z = s - s_max
    p = jnp.exp(z.astype(jnp.bfloat16) if exp_bf16 else z)                      # (TQ, Np)
    l = jnp.sum(p.astype(jnp.float32), axis=-1, keepdims=True)                  # (TQ, 1)  f32

    # Attention-apply with Wv pre-folded into hv^T; bv added after the 1/l scale.
    mvT = jnp.dot(p.astype(jnp.bfloat16), hvT_sc[...],
                  preferred_element_type=jnp.float32)                           # (TQ, C)
    vT = mvT * pl.reciprocal(l, approx=True) + bv_ref[...]                      # (TQ, C)

    # Residual in f32; only the small (TQ, C) tile is transposed back to (C, TQ).
    x_t = x_ref[:, pl.ds(toff, TQ)]                                             # (C, TQ) f32
    out_ref[...] = (x_t + gamma_ref[0] * vT.T).astype(out_ref.dtype)


def self_attn_pallas(x_nchw, params, *, tq=None):
    """x_nchw: (B, C, W, H) float32.  Returns (B, C, W, H)."""
    B, C, W, H = x_nchw.shape
    N = W * H
    Ck = C // 8
    CF = 2 * Ck + C

    wq, bq, wk, bk, wh, bh, wv, bv, gamma = params
    x_flat = x_nchw.reshape(B, C, N)

    # Pad the spatial/key dimension up to a lane-dense multiple of 128.
    Np = ((N + 127) // 128) * 128
    if Np != N:
        x_flat = jnp.pad(x_flat, ((0, 0), (0, 0), (0, Np - N)))

    if tq is None:
        tq = 128
        for cand in (512, 256):
            # Bigger query tile when it divides Np and the (tq, Np) f32 score
            # temporary stays modest.
            if Np % cand == 0 and cand * Np * 4 <= (8 << 20):
                tq = cand
                break
    assert Np % tq == 0, "query tile must divide padded N"
    T = Np // tq

    # Fold Wv into the H projection: hv = (Wv Wh) x + (Wv bh).  bv is added
    # in-kernel after the deferred softmax normalization (exact: both linear).
    whv = wv @ wh                                                               # (C, C)  f32
    bhv = wv @ bh                                                               # (C,)    f32
    w_fused = jnp.concatenate([wq, wk, whv], axis=0).astype(jnp.bfloat16)       # (CF, C) bf16
    b_fused = jnp.concatenate([bq, bk, bhv], axis=0).reshape(CF, 1)             # (CF, 1) f32
    bv2 = bv.reshape(1, C)                                                      # (1, C)  f32

    exp_bf16 = _eup_supports_bf16()
    kernel = functools.partial(self_attn_kernel, Ck=Ck, TQ=tq,
                               N_valid=N, exp_bf16=exp_bf16)

    # Explicit VMEM budget: double-buffered x / out slabs + caches + score
    # temporaries, capped at 64 MiB so the request is also valid on v7x.
    vmem_est = (2 * C * Np * 4 + 2 * C * tq * 4
                + 2 * Ck * Np * 2 + Np * C * 2
                + 4 * tq * Np * 4 + (4 << 20))
    vmem_limit = int(min(max(vmem_est, 32 << 20), 64 << 20))

    out = pl.pallas_call(
        kernel,
        out_shape=jax.ShapeDtypeStruct((B, C, Np), x_flat.dtype),
        grid=(B, T),
        in_specs=[
            pl.BlockSpec((None, C, Np), lambda b, t: (b, 0, 0)),    # x (per-batch slab)
            pl.BlockSpec((CF, C), lambda b, t: (0, 0)),             # Wq | Wk | Wv·Wh (bf16)
            pl.BlockSpec((CF, 1), lambda b, t: (0, 0)),             # fused bias
            pl.BlockSpec((1, C), lambda b, t: (0, 0)),              # bv
            pl.BlockSpec(memory_space=pltpu.MemorySpace.SMEM),      # gamma scalar
        ],
        out_specs=pl.BlockSpec((None, C, tq), lambda b, t: (b, 0, t)),
        scratch_shapes=[
            pltpu.VMEM((Ck, Np), jnp.bfloat16),   # q cache  (lane-dense, per batch)
            pltpu.VMEM((Ck, Np), jnp.bfloat16),   # k cache
            pltpu.VMEM((Np, C), jnp.bfloat16),    # (Wv·h)^T cache
        ],
        compiler_params=pltpu.CompilerParams(
            dimension_semantics=("parallel", "arbitrary"),
            vmem_limit_bytes=vmem_limit),
    )(x_flat, w_fused, b_fused, bv2, gamma)

    return out[:, :, :N].reshape(B, C, W, H)


def self_attn_ref(x_nchw, params):
    """Pure-JAX f32 reference mirroring the PyTorch forward."""
    wq, bq, wk, bk, wh, bh, wv, bv, gamma = params
    B, C, W, H = x_nchw.shape
    N = W * H
    x = x_nchw.reshape(B, C, N)
    q = jnp.einsum('oc,bcn->bon', wq, x) + bq[None, :, None]
    k = jnp.einsum('oc,bcn->bon', wk, x) + bk[None, :, None]
    s = jnp.einsum('bci,bcj->bij', q, k)
    a = jax.nn.softmax(s, axis=-1)
    h = jnp.einsum('oc,bcn->bon', wh, x) + bh[None, :, None]
    m = jnp.einsum('bcj,bij->bci', h, a)
    v = jnp.einsum('oc,bcn->bon', wv, m) + bv[None, :, None]
    out = x + gamma[0] * v
    return out.reshape(B, C, W, H)


def init_params(key, C):
    """Deterministic init; shapes match nn.Conv2d(..., kernel_size=1) weights."""
    Ck = C // 8
    keys = jax.random.split(key, 8)
    scale = 1.0 / jnp.sqrt(C)
    wq = jax.random.uniform(keys[0], (Ck, C), jnp.float32, -scale, scale)
    bq = jax.random.uniform(keys[1], (Ck,), jnp.float32, -scale, scale)
    wk = jax.random.uniform(keys[2], (Ck, C), jnp.float32, -scale, scale)
    bk = jax.random.uniform(keys[3], (Ck,), jnp.float32, -scale, scale)
    wh = jax.random.uniform(keys[4], (C, C), jnp.float32, -scale, scale)
    bh = jax.random.uniform(keys[5], (C,), jnp.float32, -scale, scale)
    wv = jax.random.uniform(keys[6], (C, C), jnp.float32, -scale, scale)
    bv = jax.random.uniform(keys[7], (C,), jnp.float32, -scale, scale)
    gamma = jnp.zeros((1,), jnp.float32)   # nn.Parameter(torch.zeros(1)) as in __init__
    return (wq, bq, wk, bk, wh, bh, wv, bv, gamma)


if __name__ == "__main__":
    key = jax.random.PRNGKey(0)
    k_x, k_p = jax.random.split(key)

    B, C, W, H = 2, 64, 16, 16            # in_dim=64 (k=8 divisibility), N = 256
    x = jax.random.normal(k_x, (B, C, W, H), jnp.float32)
    params = init_params(k_p, C)

    # Test 1: module-init gamma = 0 (output == x).
    out0 = jax.block_until_ready(self_attn_pallas(x, params))
    ref0 = self_attn_ref(x, params)
    assert out0.shape == (B, C, W, H)
    assert jnp.allclose(out0, ref0, atol=5e-2, rtol=5e-2)

    # Test 2: nonzero gamma so the attention path is actually exercised
    # (bf16 MXU inputs / bf16 exp -> loosened tolerance vs f32 reference).
    params_nz = params[:-1] + (jnp.array([0.7], jnp.float32),)
    out1 = jax.block_until_ready(self_attn_pallas(x, params_nz))
    ref1 = self_attn_ref(x, params_nz)
    assert jnp.allclose(out1, ref1, atol=5e-2, rtol=5e-2), "mismatch vs JAX reference"

    print("KERNEL_OK")
</pallas_src>

<mosaic_0001>
module attributes {stable_mosaic.version = 11 : i64} {
  func.func @self_attn_kernel(%arg0: i32, %arg1: i32, %arg2: memref<1x64x256xf32, #tpu.memory_space<vmem>>, %arg3: memref<80x64xbf16, #tpu.memory_space<vmem>>, %arg4: memref<80x1xf32, #tpu.memory_space<vmem>>, %arg5: memref<1x64xf32, #tpu.memory_space<vmem>>, %arg6: memref<1xf32, #tpu.memory_space<smem>>, %arg7: memref<1x64x256xf32, #tpu.memory_space<vmem>>, %arg8: memref<8x256xbf16, #tpu.memory_space<vmem>>, %arg9: memref<8x256xbf16, #tpu.memory_space<vmem>>, %arg10: memref<256x64xbf16, #tpu.memory_space<vmem>>) attributes {dimension_semantics = [#tpu.dimension_semantics<parallel>, #tpu.dimension_semantics<arbitrary>], iteration_bounds = array<i64: 2, 1>, scalar_prefetch = 0 : i64, scratch_operands = 3 : i64, tpu.core_type = #tpu.core_type<tc>, window_params = [{transform_indices = @transform_0, window_bounds = array<i64: 1, 64, 256>}, {pipeline_mode = #tpu.pipeline_mode<synchronous>, transform_indices = @transform_1, window_bounds = array<i64: 80, 64>}, {pipeline_mode = #tpu.pipeline_mode<synchronous>, transform_indices = @transform_2, window_bounds = array<i64: 80, 1>}, {pipeline_mode = #tpu.pipeline_mode<synchronous>, transform_indices = @transform_3, window_bounds = array<i64: 1, 64>}, {transform_indices = @transform_4, window_bounds = array<i64: 1>}, {transform_indices = @transform_5, window_bounds = array<i64: 1, 64, 256>}]} {
    %c0_i32 = arith.constant 0 : i32
    %0 = arith.cmpi eq, %arg1, %c0_i32 : i32
    %1 = arith.extui %0 : i1 to i32
    %c0_i32_0 = arith.constant 0 : i32
    %2 = arith.cmpi ne, %1, %c0_i32_0 : i32
    scf.if %2 {
      %c0_16 = arith.constant 0 : index
      %c0_17 = arith.constant 0 : index
      %c0_18 = arith.constant 0 : index
      %37 = vector.load %arg2[%c0_16, %c0_17, %c0_18] : memref<1x64x256xf32, #tpu.memory_space<vmem>>, vector<1x64x256xf32>
      %38 = vector.shape_cast %37 : vector<1x64x256xf32> to vector<64x256xf32>
      %39 = arith.truncf %38 : vector<64x256xf32> to vector<64x256xbf16>
      %c0_19 = arith.constant 0 : index
      %c0_20 = arith.constant 0 : index
      %40 = vector.load %arg3[%c0_19, %c0_20] : memref<80x64xbf16, #tpu.memory_space<vmem>>, vector<80x64xbf16>
      %cst_21 = arith.constant dense<0.000000e+00> : vector<80x256xf32>
      %41 = tpu.matmul %40, %39, %cst_21 {dimension_numbers = #tpu.dot_dimension_numbers<[1], [0], [0], [1], [0, 0, 1, 1], [], []>} : vector<80x64xbf16>, vector<64x256xbf16>, vector<80x256xf32> -> vector<80x256xf32>
      %c0_22 = arith.constant 0 : index
      %c0_23 = arith.constant 0 : index
      %42 = vector.load %arg4[%c0_22, %c0_23] : memref<80x1xf32, #tpu.memory_space<vmem>>, vector<80x1xf32>
      %43 = vector.broadcast %42 : vector<80x1xf32> to vector<80x256xf32>
      %44 = arith.addf %41, %43 : vector<80x256xf32>
      %45 = vector.extract_strided_slice %44 {offsets = [0, 0], sizes = [8, 256], strides = [1, 1]} : vector<80x256xf32> to vector<8x256xf32>
      %46 = arith.truncf %45 : vector<8x256xf32> to vector<8x256xbf16>
      %c0_24 = arith.constant 0 : index
      %c0_25 = arith.constant 0 : index
      %47 = vector.load %arg8[%c0_24, %c0_25] : memref<8x256xbf16, #tpu.memory_space<vmem>>, vector<8x256xbf16>
      tpu.vector_store %arg8[%c0_24, %c0_25], %46 {strides = array<i32>} : memref<8x256xbf16, #tpu.memory_space<vmem>>, vector<8x256xbf16>,
      %48 = vector.extract_strided_slice %44 {offsets = [8, 0], sizes = [8, 256], strides = [1, 1]} : vector<80x256xf32> to vector<8x256xf32>
      %49 = arith.truncf %48 : vector<8x256xf32> to vector<8x256xbf16>
      %c0_26 = arith.constant 0 : index
      %c0_27 = arith.constant 0 : index
      %50 = vector.load %arg9[%c0_26, %c0_27] : memref<8x256xbf16, #tpu.memory_space<vmem>>, vector<8x256xbf16>
      tpu.vector_store %arg9[%c0_26, %c0_27], %49 {strides = array<i32>} : memref<8x256xbf16, #tpu.memory_space<vmem>>, vector<8x256xbf16>,
      %51 = vector.extract_strided_slice %44 {offsets = [16, 0], sizes = [64, 256], strides = [1, 1]} : vector<80x256xf32> to vector<64x256xf32>
      %52 = arith.truncf %51 : vector<64x256xf32> to vector<64x256xbf16>
      %53 = tpu.transpose %52, [1, 0] : vector<64x256xbf16> -> vector<256x64xbf16>
      %c0_28 = arith.constant 0 : index
      %c0_29 = arith.constant 0 : index
      %54 = vector.load %arg10[%c0_28, %c0_29] : memref<256x64xbf16, #tpu.memory_space<vmem>>, vector<256x64xbf16>
      tpu.vector_store %arg10[%c0_28, %c0_29], %53 {strides = array<i32>} : memref<256x64xbf16, #tpu.memory_space<vmem>>, vector<256x64xbf16>,
    } else {
    }
    %c256_i32 = arith.constant 256 : i32
    %3 = arith.muli %arg1, %c256_i32 : i32
    %4 = tpu.assume_multiple %3, 256 : i32
    %c0 = arith.constant 0 : index
    %5 = arith.index_cast %4 : i32 to index
    %6 = vector.load %arg8[%c0, %5] : memref<8x256xbf16, #tpu.memory_space<vmem>>, vector<8x256xbf16>
    %7 = tpu.transpose %6, [1, 0] : vector<8x256xbf16> -> vector<256x8xbf16>
    %c0_1 = arith.constant 0 : index
    %c0_2 = arith.constant 0 : index
    %8 = vector.load %arg9[%c0_1, %c0_2] : memref<8x256xbf16, #tpu.memory_space<vmem>>, vector<8x256xbf16>
    %cst = arith.constant dense<0.000000e+00> : vector<256x256xf32>
    %9 = tpu.matmul %7, %8, %cst {dimension_numbers = #tpu.dot_dimension_numbers<[1], [0], [0], [1], [0, 0, 1, 1], [], []>} : vector<256x8xbf16>, vector<8x256xbf16>, vector<256x256xf32> -> vector<256x256xf32>
    %cst_3 = arith.constant dense<0xFF800000> : vector<256xf32>
    %10 = vector.multi_reduction <maximumf>, %9, %cst_3 [1] : vector<256x256xf32> to vector<256xf32>
    %11 = vector.shape_cast %10 : vector<256xf32> to vector<256x1xf32>
    %12 = vector.broadcast %11 : vector<256x1xf32> to vector<256x256xf32>
    %13 = arith.subf %9, %12 : vector<256x256xf32>
    %14 = math.exp %13 : vector<256x256xf32>
    %cst_4 = arith.constant dense<0.000000e+00> : vector<256xf32>
    %15 = vector.multi_reduction <add>, %14, %cst_4 [1] : vector<256x256xf32> to vector<256xf32>
    %16 = vector.shape_cast %15 : vector<256xf32> to vector<256x1xf32>
    %17 = arith.truncf %14 : vector<256x256xf32> to vector<256x256xbf16>
    %c0_5 = arith.constant 0 : index
    %c0_6 = arith.constant 0 : index
    %18 = vector.load %arg10[%c0_5, %c0_6] : memref<256x64xbf16, #tpu.memory_space<vmem>>, vector<256x64xbf16>
    %cst_7 = arith.constant dense<0.000000e+00> : vector<256x64xf32>
    %19 = tpu.matmul %17, %18, %cst_7 {dimension_numbers = #tpu.dot_dimension_numbers<[1], [0], [0], [1], [0, 0, 1, 1], [], []>} : vector<256x256xbf16>, vector<256x64xbf16>, vector<256x64xf32> -> vector<256x64xf32>
    %20 = tpu.reciprocal %16 {approx = true} : vector<256x1xf32> -> vector<256x1xf32>
    %21 = vector.broadcast %20 : vector<256x1xf32> to vector<256x64xf32>
    %22 = arith.mulf %19, %21 : vector<256x64xf32>
    %c0_8 = arith.constant 0 : index
    %c0_9 = arith.constant 0 : index
    %23 = vector.load %arg5[%c0_8, %c0_9] : memref<1x64xf32, #tpu.memory_space<vmem>>, vector<1x64xf32>
    %24 = vector.broadcast %23 : vector<1x64xf32> to vector<256x64xf32>
    %25 = arith.addf %22, %24 : vector<256x64xf32>
    %c0_10 = arith.constant 0 : index
    %c0_11 = arith.constant 0 : index
    %26 = arith.index_cast %4 : i32 to index
    %27 = vector.load %arg2[%c0_10, %c0_11, %26] : memref<1x64x256xf32, #tpu.memory_space<vmem>>, vector<1x64x256xf32>
    %28 = vector.shape_cast %27 : vector<1x64x256xf32> to vector<64x256xf32>
    %c0_12 = arith.constant 0 : index
    %29 = memref.load %arg6[%c0_12] : memref<1xf32, #tpu.memory_space<smem>>
    %30 = tpu.transpose %25, [1, 0] : vector<256x64xf32> -> vector<64x256xf32>
    %31 = vector.broadcast %29 : f32 to vector<64x256xf32>
    %32 = arith.mulf %31, %30 : vector<64x256xf32>
    %33 = arith.addf %28, %32 : vector<64x256xf32>
    %c0_13 = arith.constant 0 : index
    %c0_14 = arith.constant 0 : index
    %c0_15 = arith.constant 0 : index
    %34 = vector.load %arg7[%c0_13, %c0_14, %c0_15] : memref<1x64x256xf32, #tpu.memory_space<vmem>>, vector<1x64x256xf32>
    %35 = vector.shape_cast %34 : vector<1x64x256xf32> to vector<64x256xf32>
    %36 = vector.shape_cast %33 : vector<64x256xf32> to vector<1x64x256xf32>
    tpu.vector_store %arg7[%c0_13, %c0_14, %c0_15], %36 {strides = array<i32>} : memref<1x64x256xf32, #tpu.memory_space<vmem>>, vector<1x64x256xf32>,
    return
  }
  func.func @transform_0(%arg0: i32, %arg1: i32) -> (i32, i32, i32) {
    %c0_i32 = arith.constant 0 : i32
    %c0_i32_0 = arith.constant 0 : i32
    %c0_i32_1 = arith.constant 0 : i32
    return %arg0, %c0_i32, %c0_i32_0 : i32, i32, i32
  }
  func.func @transform_1(%arg0: i32, %arg1: i32) -> (i32, i32) {
    %c0_i32 = arith.constant 0 : i32
    %c0_i32_0 = arith.constant 0 : i32
    %c0_i32_1 = arith.constant 0 : i32
    return %c0_i32, %c0_i32_0 : i32, i32
  }
  func.func @transform_2(%arg0: i32, %arg1: i32) -> (i32, i32) {
    %c0_i32 = arith.constant 0 : i32
    %c0_i32_0 = arith.constant 0 : i32
    %c0_i32_1 = arith.constant 0 : i32
    return %c0_i32, %c0_i32_0 : i32, i32
  }
  func.func @transform_3(%arg0: i32, %arg1: i32) -> (i32, i32) {
    %c0_i32 = arith.constant 0 : i32
    %c0_i32_0 = arith.constant 0 : i32
    %c0_i32_1 = arith.constant 0 : i32
    return %c0_i32, %c0_i32_0 : i32, i32
  }
  func.func @transform_4(%arg0: i32, %arg1: i32) -> i32 {
    %c0_i32 = arith.constant 0 : i32
    %c0_i32_0 = arith.constant 0 : i32
    return %c0_i32 : i32
  }
  func.func @transform_5(%arg0: i32, %arg1: i32) -> (i32, i32, i32) {
    %c0_i32 = arith.constant 0 : i32
    %c0_i32_0 = arith.constant 0 : i32
    return %arg0, %c0_i32, %arg1 : i32, i32, i32
  }
}

</mosaic_0001>

<bundles_post_ra>
// kernel: tpu_custom_call.1
= control target key start
LH: loop header
LB: loop body
LE: loop exit
PB: predicated region body
PF: predicated region fallthrough
CT: control target
= control target key end

     0   :  { %s3339_s0 = inlined_call_operand.hbm [shape: f32[2,64,256], index: 0, kind: input, shape index: {}]   ;;  %s3340_s1 = inlined_call_operand.vmem [shape: bf16[80,64], index: 1, kind: input, shape index: {}]   ;;  %s3341_s2 = inlined_call_operand.vmem [shape: f32[80,1], index: 2, kind: input, shape index: {}]   ;;  %s3342_s3 = inlined_call_operand.vmem [shape: f32[1,64], index: 3, kind: input, shape index: {}]   ;;  %s3343_s4 = inlined_call_operand.<no memory space> [shape: f32[1], index: 4, kind: input, shape index: {}]   ;;  %s3344_s5 = inlined_call_operand.hbm [shape: f32[2,64,256], index: 5, kind: output, shape index: {}]  }
   0x1   :  { %10 = sst [smem:[#allocation5]] %s3343_s4 }
   0x2   :  { %11 = vsyncpa [#allocation7], 0 }
   0x3   :  { %13 = vsyncpa [#allocation7 + $0x1], 0 }
   0x4   :  { %14 = vsyncpa [#allocation8], 0 }
   0x5   :  { %16 = vsyncpa [#allocation8 + $0x1], 0  ;;  %s2393_s20 = smov 0   ;;  %s2395_s21 = smov 0  }
   0x6   :  { %s2397_s22 = smov 0   ;;  %s2399_s23 = smov 0  }
   0x7   :  { %s2401_s24 = smov 0   ;;  %s2403_s25 = smov 0  }
   0x8 LB: > { %s1788_s4 = sadd.s32 4294967295, %s2351_s25   ;;  %s1789_s26 = sadd.s32 4294967294, %s2351_s25   ;;  %s2351_s25 = sphi %s2403_s25, %s22_s25   ;;  %s2347_s24 = sphi %s2401_s24, %s3421_s24   ;;  %s2343_s23 = sphi %s2399_s23, %s3420_s23   ;;  %s2339_s22 = sphi %s2397_s22, %s3419_s22   ;;  %s2335_s21 = sphi %s2395_s21, %s3418_s21   ;;  %s2331_s20 = sphi %s2393_s20, %s3417_s20  }
   0x9   : > { %s34_s27 = sadd.s32 1, %s2347_s24  ;;  %s41_s28 = sadd.s32 1, %s2339_s22 }
   0xa   : > { %p36_p0 = scmp.ge.s32.totalorder %s34_s27, 2  ;;  %p48_p1 = scmp.ne.s32.totalorder %s2339_s22, %s2335_s21 }
   0xb   : > { %p49_p2 = scmp.eq.s32.totalorder %s2351_s25, 0  ;;  %p54_p3 = scmp.ne.s32.totalorder %s2335_s21, %s2331_s20 }
   0xc   : > { %s3423_s27 = smov (%p36_p0, %s34_s27), 0  ;;  %p55_p5 = scmp.eq.s32.totalorder %s1788_s4, 0 }
   0xd   : > { %p2434_p4 = por %p49_p2, %p48_p1  ;;  %s38_s30 = ssub.s32 %s2347_s24, %s3423_s27 }
   0xe   : > { %p164_p6 = scmp.eq.s32.totalorder %s1788_s4, 1  ;;  %p39_p7 = scmp.eq.s32.totalorder %s38_s30, 0 }
   0xf   : > { %p2440_p8 = por %p55_p5, %p54_p3  ;;  %p170_p10 = scmp.eq.s32.totalorder %s1789_s26, 1 }
  0x10   : > { %p2444_p9 = por %p164_p6, %p48_p1  ;;  %p1985_p13 = scmp.lt.s32.totalorder %s2351_s25, 2 }
  0x11   : > { %s2449_s8 = scalar_select %p39_p7, %s2339_s22, %s41_s28  }
  0x12   : > { %s3365_s7 = scalar_select %p2444_p9, 1, 0 }
  0x13   : > { %p2451_p11 = por %p170_p10, %p54_p3  ;;  %s202_s10 = sand.u32 1, %s2339_s22  }
  0x14   : > { %s1792_s11 = sshll.u32 %s202_s10, 7  ;;  %s1837_s12 = sshll.u32 %s2347_s24, 11 }
  0x15   : > { %s3366_s9 = scalar_select %p2451_p11, 1, 0 }
  0x16   : > { %s2462_s15 = scalar_lea.hbm %s3339_s0, %s1837_s12  ;;  %s206_s16 = scalar_lea.vmem [#allocation6], %s1792_s11 }
  0x17   : > { %s213_s17 = sshll.u32 %s206_s16, 4  ;;  %p2468_p0 = pnand %p1985_p13, %p2434_p4  ;;  %s2464_s17 = int_to_ptr.vmem [resolvable:$true] %s213_s17 }
  0x18   : > { %s2473_s19 = scalar_lea.sflag [#allocation7], %s202_s10  ;;  %s2239_s4 = scalar_lea.hbm %s2462_s15, 2048 }
  0x19   : > { %p2240_p2 = scmp.ne.s32.totalorder %s2462_s15, %s2239_s4  ;;  %p2241_p3 = pneg %p2468_p0 }
  0x1a   : > { %s2244_s29 = scalar_lea.hbm %s3339_s0, 4096  ;;  %p2245_p4 = scmp.lt.u32.totalorder %s2462_s15, %s3339_s0 }
  0x1b   : > { %p2242_p5 = pnand %p2241_p3, %p2240_p2  ;;  %p2246_p7 = scmp.lt.u32.totalorder %s2244_s29, %s2239_s4 }
  0x1c   : > { %p2248_p13 = scmp.lt.u32.totalorder %s2239_s4, %s2462_s15 }
  0x1d   : > { %p2243_p6 = pneg %p2242_p5  ;;  %p2247_p10 = por %p2246_p7, %p2245_p4 }
  0x1f   : > { %p2249_p12 = por %p2248_p13, %p2247_p10 }
  0x21   : > { %p2250_p1 = pnand %p2249_p12, %p2243_p6 }
  0x23   : > { %2253 = shalt.err (!%p2250_p1)
}
  0x24   : > { %s2254_s10 = scalar_lea.vmem %s2464_s17, 2048  ;;  %s2353_s12 = smov [#allocation6]  }
  0x25   : > { %p2255_p2 = scmp.ne.s32.totalorder %s2464_s17, %s2254_s10  ;;  %s2259_s13 = sshll.u32 %s2353_s12, 4  ;;  %s2260_s13 = int_to_ptr.vmem [resolvable:$false] %s2259_s13 }
  0x26   : > { %s2261_s14 = scalar_lea.vmem %s2260_s13, 4096  ;;  %p2262_p9 = scmp.lt.s32.totalorder %s2464_s17, %s2260_s13 }
  0x27   : > { %p2257_p5 = pnand %p2255_p2, %p2241_p3  ;;  %p2263_p4 = scmp.lt.s32.totalorder %s2261_s14, %s2254_s10 }
  0x29   : > { %p2258_p11 = pneg %p2257_p5  ;;  %p2264_p7 = por %p2263_p4, %p2262_p9 }
  0x2b   : > { %p2265_p10 = pnand %p2264_p7, %p2258_p11 }
  0x2d   : > { %2268 = shalt.err (!%p2265_p10)
}
  0x2e   : > { %s2354_s16 = smov 256   ;;  %s2355_s4 = smov 16  }
  0x2f   : > { %1980 = dma.hbm_to_vmem [thread:$0]  (!%p2468_p0), %s2462_s15, 2048, %s2464_s17, %s2473_s19, %s2354_s16, %s2354_s16, %s2355_s4  }
  0x30   : > { %p221_p12 = scmp.lt.s32.totalorder %s2351_s25, 3  ;;  %p3368_p1 = scmp.ge.s32.totalorder %s2351_s25, 1 }
  0x32   : > { %p222_p3 = pnand %p3368_p1, %p221_p12 }
  0x34   : > { %225 = sbr.rel (%p222_p3) target bundleno = 1319 (0x527), region = 40 }
  0x3b   : > { %s2505_s26 = sand.u32 1, %s2335_s21  }
  0x3c   : > { %s1796_s28 = sshll.u32 %s2505_s26, 7  ;;  %s228_s29 = scalar_lea.sflag [#allocation7], %s2505_s26 }
  0x3d   : > { %s2511_s30 = scalar_lea.vmem [#allocation6], %s1796_s28 }
  0x3e   : > { %2322 = dma.done.wait (%p2440_p8), %s228_s29, 2048  }
  0x3f   : > { %2324 = vsyncadd (%p2440_p8), %s228_s29, 4294965248  ;;  %v2356_v0 = vmov 0   ;;  %v265_v1 = vld [vmem:[%s2511_s30 + $0x8] sm:$0xff]  ;;  %v267_v2 = vld [vmem:[%s2511_s30 + $0x18] sm:$0xff]  ;;  %vm383_vm0 = vcmask 523264   ;;  %vm656_vm1 = vcmask 1043456  }
  0x40   : > { %431 = vmatprep.mubr.bf16.mxu0 %v2356_v0  ;;  %2040 = vset.pattern.permute.xlu0 %v2356_v0  ;;  %v264_v3 = vld [vmem:[%s2511_s30] sm:$0xff]  ;;  %v281_v4 = vpack.c.bf16 %v267_v2, %v265_v1  ;;  %v266_v5 = vld [vmem:[%s2511_s30 + $0x10] sm:$0xff]  ;;  %v269_v6 = vld [vmem:[%s2511_s30 + $0x28] sm:$0xff]  ;;  %vm607_vm2 = vcmask 64512   ;;  %s1570_s10 = sld [smem:[#allocation5]]  ;;  %s3236_s12 = scalar_lea.vmem [#allocation9], %s1796_s28 }
  0x41   : > { %695 = vmatprep.mubr.bf16.mxu1 %v2356_v0  ;;  %v271_v7 = vld [vmem:[%s2511_s30 + $0x38] sm:$0xff]  ;;  %v280_v8 = vpack.c.bf16 %v266_v5, %v264_v3  ;;  %v268_v10 = vld [vmem:[%s2511_s30 + $0x20] sm:$0xff]  ;;  %v270_v11 = vld [vmem:[%s2511_s30 + $0x30] sm:$0xff]  ;;  %s1840_s28 = sshll.u32 %s2343_s23, 11  ;;  %s1700_s13 = sshll.u32 %s3236_s12, 4  ;;  %s3289_s13 = int_to_ptr.vmem [resolvable:$true] %s1700_s13 }
  0x42   : > { %v283_v9 = vpack.c.bf16 %v271_v7, %v269_v6  ;;  %v273_v12 = vld [vmem:[%s2511_s30 + $0x48] sm:$0xff]  ;;  %399 = vmatprep.subr.bf16.mxu0 %v281_v4  ;;  %v275_v13 = vld [vmem:[%s2511_s30 + $0x58] sm:$0xff]  ;;  %v282_v14 = vpack.c.bf16 %v270_v11, %v268_v10  ;;  %v272_v15 = vld [vmem:[%s2511_s30 + $0x40] sm:$0xff]  ;;  %s3287_s4 = scalar_lea.hbm %s3344_s5, %s1840_s28  ;;  %s1685_s29 = scalar_lea.sflag [#allocation8], %s2505_s26 }
  0x43   : > { %400 = vmatpush1.bf16.msra.mxu0 %v280_v8  ;;  %v274_v16 = vld [vmem:[%s2511_s30 + $0x50] sm:$0xff]  ;;  %v285_v17 = vpack.c.bf16 %v275_v13, %v273_v12  ;;  %v277_v18 = vld [vmem:[%s2511_s30 + $0x68] sm:$0xff]  ;;  %v279_v19 = vld [vmem:[%s2511_s30 + $0x78] sm:$0xff]  ;;  %s2269_s23 = scalar_lea.vmem %s3289_s13, 2048  ;;  %p3414_p9 = scmp.ne.s32.totalorder %s3365_s7, 0 }
  0x44   : > { %401 = vmatprep.subr.bf16.mxu0 %v283_v9  ;;  %v284_v20 = vpack.c.bf16 %v274_v16, %v272_v15  ;;  %v276_v21 = vld [vmem:[%s2511_s30 + $0x60] sm:$0xff]  ;;  %v287_v22 = vpack.c.bf16 %v279_v19, %v277_v18  ;;  %v278_v23 = vld [vmem:[%s2511_s30 + $0x70] sm:$0xff]  ;;  %v299_v26 = vld [vmem:[%s3341_s2 + $0x8] sm:$0xff]  ;;  %p2270_p8 = scmp.ne.s32.totalorder %s3289_s13, %s2269_s23 }
  0x45   : > { %v298_v24 = vld [vmem:[%s3341_s2] sm:$0xff]  ;;  %v286_v25 = vpack.c.bf16 %v278_v23, %v276_v21  ;;  %v300_v28 = vld [vmem:[%s3341_s2 + $0x10] sm:$0xff]  ;;  %v301_v29 = vld [vmem:[%s3341_s2 + $0x18] sm:$0xff] }
  0x46   : > { %310 = vperm.xlu0 %2040, %v298_v24   ;;  %v2042_v27 = vld [vmem:[%s3340_s1] sm:$0xff]   ;;  %v2043_v30 = vld [vmem:[%s3340_s1 + $0x8] sm:$0xff]   ;;  %v2044_v33 = vld [vmem:[%s3340_s1 + $0x10] sm:$0xff]   ;;  %p2271_p11 = pnand %p2270_p8, %p3414_p9 }
  0x47   : > { %402 = vmatpush1.bf16.msra.mxu0 %v282_v14  ;;  %v302_v31 = vld [vmem:[%s3341_s2 + $0x20] sm:$0xff]  ;;  %v303_v32 = vld [vmem:[%s3341_s2 + $0x28] sm:$0xff]  ;;  %v304_v34 = vld [vmem:[%s3341_s2 + $0x30] sm:$0xff] }
  0x48   : > { %403 = vmatprep.subr.bf16.mxu0 %v285_v17  ;;  %v305_v35 = vld [vmem:[%s3341_s2 + $0x38] sm:$0xff]  ;;  %v306_v37 = vld [vmem:[%s3341_s2 + $0x40] sm:$0xff]  ;;  %p2272_p0 = pneg %p2271_p11 }
  0x49   : > { %v2045_v36 = vld [vmem:[%s3340_s1 + $0x18] sm:$0xff]   ;;  %v2046_v38 = vld [vmem:[%s3340_s1 + $0x20] sm:$0xff]  }
  0x4a   : > { %315 = vperm.xlu0 %2040, %v299_v26  }
  0x4b   : > { %404 = vmatpush1.bf16.msra.mxu0 %v284_v20 }
  0x4c   : > { %405 = vmatprep.subr.bf16.mxu0 %v287_v22 }
  0x4e   : > { %320 = vperm.xlu0 %2040, %v300_v28  }
  0x4f   : > { %406 = vmatpush1.bf16.msra.mxu0 %v286_v25 }
  0x52   : > { %1803 = vmatmul.mubr.msk.bf16.vlgmr.msra.gmra.mrb[0].mxu0 %vm383_vm0, %v2042_v27  ;;  %325 = vperm.xlu0 %2040, %v301_v29  }
  0x53   : > { %441 = vmatprep.mubr.bf16.mxu0 %v2356_v0 }
  0x56   : > { %330 = vperm.xlu0 %2040, %v302_v31   ;;  %v307_v31 = vld [vmem:[%s3341_s2 + $0x48] sm:$0xff] }
  0x5a   : > { %1804 = vmatmul.mubr.msk.bf16.gmra.mrb[4].mxu0 %vm383_vm0, %v2043_v30  ;;  %335 = vperm.xlu0 %2040, %v303_v32  }
  0x5b   : > { %451 = vmatprep.mubr.bf16.mxu0 %v2356_v0 }
  0x5e   : > { %340 = vperm.xlu0 %2040, %v304_v34  }
  0x62   : > { %1805 = vmatmul.mubr.msk.bf16.gmra.mrb[8].mxu0 %vm383_vm0, %v2044_v33  ;;  %345 = vperm.xlu0 %2040, %v305_v35  }
  0x63   : > { %461 = vmatprep.mubr.bf16.mxu0 %v2356_v0 }
  0x66   : > { %350 = vperm.xlu0 %2040, %v306_v37  }
  0x6a   : > { %1806 = vmatmul.mubr.msk.bf16.gmra.mrb[12].mxu0 %vm383_vm0, %v2045_v36 }
  0x6b   : > { %471 = vmatprep.mubr.bf16.mxu0 %v2356_v0 }
  0x72   : > { %1807 = vmatmul.mubr.msk.bf16.gmra.mrb[16].mxu0 %vm383_vm0, %v2046_v38 }
  0xc5   : > { %v311_v39 = vpop.permute.xlu0 %310 }
  0xc9   : > { %v316_v40 = vpop.permute.xlu0 %315 }
  0xcd   : > { %v321_v41 = vpop.permute.xlu0 %320 }
  0xd1   : > { %v326_v45 = vpop.permute.xlu0 %325 }
  0xd5   : > { %v331_v54 = vpop.permute.xlu0 %330 }
  0xd9   : > { %v336_v1 = vpop.permute.xlu0 %335 }
  0xdd   : > { %v341_v9 = vpop.permute.xlu0 %340 }
  0xe1   : > { %v346_v16 = vpop.permute.xlu0 %345 }
 0x125   : > { %v433_v42 = vpop.f32.mrb[0].mxu0 }
 0x126   : > { %v435_v43 = vpop.f32.mrb[1].mxu0  ;;  %v434_v44 = vadd.f32 %v433_v42, %v311_v39 }
 0x127   : > { %v437_v46 = vpop.f32.mrb[2].mxu0  ;;  %v436_v21 = vadd.f32 %v435_v43, %v311_v39 }
 0x128   : > { %v438_v47 = vadd.f32 %v437_v46, %v316_v40  ;;  %v439_v48 = vpop.f32.mrb[3].mxu0  ;;  %v1841_v49 = vpack.c.bf16 %v434_v44, %v434_v44 }
 0x129   : > { %v440_v50 = vadd.f32 %v439_v48, %v316_v40  ;;  %v1842_v26 = vpack.c.bf16 %v436_v21, %v436_v21  ;;  %v351_v48 = vpop.permute.xlu0 %350 }
 0x12a   : > { %v1843_v51 = vpack.c.bf16 %v438_v47, %v438_v47  ;;  %569 = vxpose.xlu1.c.b16.start.end [1/1] (short) %v1841_v49, 128 }
 0x12b   : > { %v1844_v52 = vpack.c.bf16 %v440_v50, %v440_v50 }
 0x12c   : > { %v658_v53 = vsel %vm656_vm1, %v1843_v51, 0 }
 0x12d   : > { %v443_v55 = vpop.f32.mrb[4].mxu0  ;;  %1814 = vmatprep.subr.msk.bf16.mxu1 %vm656_vm1, %v1844_v52 }
 0x12e   : > { %v445_v56 = vpop.f32.mrb[5].mxu0  ;;  %664 = vmatpush1.bf16.msra.mxu1 %v658_v53  ;;  %v2587_v58 = vadd.f32 %v443_v55, %v321_v41 }
 0x12f   : > { %v447_v57 = vpop.f32.mrb[6].mxu0  ;;  %v2591_v61 = vadd.f32 %v445_v56, %v321_v41 }
 0x130   : > { %v2589_v59 = vadd.f32 %v447_v57, %v326_v45  ;;  %v449_v60 = vpop.f32.mrb[7].mxu0 }
 0x131   : > { %v2593_v62 = vadd.f32 %v449_v60, %v326_v45 }
 0x132   : > { %v500_v63 = vpack.c.bf16 %v2589_v59, %v2587_v58 }
 0x133   : > { %v501_v2 = vpack.c.bf16 %v2593_v62, %v2591_v61 }
 0x135   : > { %v453_v3 = vpop.f32.mrb[8].mxu0 }
 0x136   : > { %v455_v4 = vpop.f32.mrb[9].mxu0  ;;  %v2599_v6 = vadd.f32 %v453_v3, %v331_v54 }
 0x137   : > { %v457_v5 = vpop.f32.mrb[10].mxu0  ;;  %v2603_v10 = vadd.f32 %v455_v4, %v331_v54 }
 0x138   : > { %v2601_v7 = vadd.f32 %v457_v5, %v336_v1  ;;  %v459_v8 = vpop.f32.mrb[11].mxu0 }
 0x139   : > { %v2605_v11 = vadd.f32 %v459_v8, %v336_v1 }
 0x13a   : > { %v502_v12 = vpack.c.bf16 %v2601_v7, %v2599_v6 }
 0x13b   : > { %v503_v13 = vpack.c.bf16 %v2605_v11, %v2603_v10 }
 0x13d   : > { %v463_v14 = vpop.f32.mrb[12].mxu0 }
 0x13e   : > { %v465_v15 = vpop.f32.mrb[13].mxu0  ;;  %v2611_v18 = vadd.f32 %v463_v14, %v341_v9 }
 0x13f   : > { %v467_v17 = vpop.f32.mrb[14].mxu0  ;;  %v2615_v22 = vadd.f32 %v465_v15, %v341_v9 }
 0x140   : > { %v2613_v19 = vadd.f32 %v467_v17, %v346_v16  ;;  %v469_v20 = vpop.f32.mrb[15].mxu0 }
 0x141   : > { %v2617_v23 = vadd.f32 %v469_v20, %v346_v16 }
 0x142   : > { %v504_v24 = vpack.c.bf16 %v2613_v19, %v2611_v18 }
 0x143   : > { %v505_v25 = vpack.c.bf16 %v2617_v23, %v2615_v22 }
 0x145   : > { %v473_v27 = vpop.f32.mrb[16].mxu0 }
 0x146   : > { %v475_v28 = vpop.f32.mrb[17].mxu0  ;;  %v2649_v50 = vadd.f32 %v473_v27, %v351_v48 }
 0x147   : > { %585 = vxpose.xlu1.c.b16.start.end [1/1] (short) %v1842_v26, 128  ;;  %v477_v29 = vpop.f32.mrb[18].mxu0  ;;  %v2651_v51 = vadd.f32 %v475_v28, %v351_v48 }
 0x148   : > { %v479_v30 = vpop.f32.mrb[19].mxu0 }
 0x14b   : > { %2041 = vset.pattern.permute.xlu1 %v2356_v0 }
 0x167   : > { %355 = vperm.xlu1 %2041, %v307_v31  }
 0x190   : > { %v577_v32 = vpop.trf.xlu1 }
 0x191   : > { %1815 = vmatmul.mubr.msk.bf16.vlgmr.msra.gmra.mrb[0].mxu1 %vm607_vm2, %v577_v32 }
 0x192   : > { %705 = vmatprep.mubr.bf16.mxu1 %v2356_v0 }
 0x194   : > { %v578_v33 = vpop.trf.xlu1 }
 0x198   : > { %v579_v34 = vpop.trf.xlu1 }
 0x199   : > { %1816 = vmatmul.mubr.msk.bf16.gmra.mrb[4].mxu1 %vm607_vm2, %v578_v33 }
 0x19a   : > { %715 = vmatprep.mubr.bf16.mxu1 %v2356_v0 }
 0x19c   : > { %v580_v35 = vpop.trf.xlu1 }
 0x1a0   : > { %v581_v36 = vpop.trf.xlu1 }
 0x1a1   : > { %1817 = vmatmul.mubr.msk.bf16.gmra.mrb[8].mxu1 %vm607_vm2, %v579_v34 }
 0x1a2   : > { %725 = vmatprep.mubr.bf16.mxu1 %v2356_v0 }
 0x1a4   : > { %v582_v37 = vpop.trf.xlu1 }
 0x1a8   : > { %v583_v38 = vpop.trf.xlu1 }
 0x1a9   : > { %1818 = vmatmul.mubr.msk.bf16.gmra.mrb[12].mxu1 %vm607_vm2, %v580_v35 }
 0x1aa   : > { %735 = vmatprep.mubr.bf16.mxu1 %v2356_v0 }
 0x1ac   : > { %v584_v39 = vpop.trf.xlu1 }
 0x1b0   : > { %v593_v40 = vpop.trf.xlu1 }
 0x1b1   : > { %1819 = vmatmul.mubr.msk.bf16.gmra.mrb[16].mxu1 %vm607_vm2, %v581_v36 }
 0x1b2   : > { %745 = vmatprep.mubr.bf16.mxu1 %v2356_v0 }
 0x1b4   : > { %v594_v41 = vpop.trf.xlu1 }
 0x1b8   : > { %v595_v42 = vpop.trf.xlu1 }
 0x1b9   : > { %1820 = vmatmul.mubr.msk.bf16.gmra.mrb[20].mxu1 %vm607_vm2, %v582_v37 }
 0x1ba   : > { %755 = vmatprep.mubr.bf16.mxu1 %v2356_v0 }
 0x1bc   : > { %v596_v43 = vpop.trf.xlu1 }
 0x1c0   : > { %v597_v44 = vpop.trf.xlu1 }
 0x1c1   : > { %1821 = vmatmul.mubr.msk.bf16.gmra.mrb[24].mxu1 %vm607_vm2, %v583_v38 }
 0x1c2   : > { %765 = vmatprep.mubr.bf16.mxu1 %v2356_v0 }
 0x1c4   : > { %v598_v45 = vpop.trf.xlu1 }
 0x1c8   : > { %v599_v46 = vpop.trf.xlu1 }
 0x1c9   : > { %1822 = vmatmul.mubr.msk.bf16.gmra.mrb[28].mxu1 %vm607_vm2, %v584_v39 }
 0x1ca   : > { %775 = vmatprep.mubr.bf16.mxu1 %v2356_v0 }
 0x1cc   : > { %v600_v47 = vpop.trf.xlu1 }
 0x1d1   : > { %1823 = vmatmul.mubr.msk.bf16.gmra.mrb[32].mxu1 %vm607_vm2, %v593_v40 }
 0x1d2   : > { %785 = vmatprep.mubr.bf16.mxu1 %v2356_v0 }
 0x1d9   : > { %1824 = vmatmul.mubr.msk.bf16.gmra.mrb[36].mxu1 %vm607_vm2, %v594_v41 }
 0x1da   : > { %795 = vmatprep.mubr.bf16.mxu1 %v2356_v0 }
 0x1e1   : > { %1825 = vmatmul.mubr.msk.bf16.gmra.mrb[40].mxu1 %vm607_vm2, %v595_v42 }
 0x1e2   : > { %805 = vmatprep.mubr.bf16.mxu1 %v2356_v0 }
 0x1e6   : > { %v356_v49 = vpop.permute.xlu1 %355 }
 0x1e7   : > { %v2653_v52 = vadd.f32 %v477_v29, %v356_v49  ;;  %v2655_v53 = vadd.f32 %v479_v30, %v356_v49 }
 0x1e9   : > { %v506_v54 = vpack.c.bf16 %v2653_v52, %v2649_v50  ;;  %v507_v55 = vpack.c.bf16 %v2655_v53, %v2651_v51  ;;  %1826 = vmatmul.mubr.msk.bf16.gmra.mrb[44].mxu1 %vm607_vm2, %v596_v43 }
 0x1ea   : > { %815 = vmatprep.mubr.bf16.mxu1 %v2356_v0 }
 0x1f1   : > { %1827 = vmatmul.mubr.msk.bf16.gmra.mrb[48].mxu1 %vm607_vm2, %v597_v44 }
 0x1f2   : > { %825 = vmatprep.mubr.bf16.mxu1 %v2356_v0 }
 0x1f9   : > { %1828 = vmatmul.mubr.msk.bf16.gmra.mrb[52].mxu1 %vm607_vm2, %v598_v45 }
 0x1fa   : > { %835 = vmatprep.mubr.bf16.mxu1 %v2356_v0 }
 0x201   : > { %1829 = vmatmul.mubr.msk.bf16.gmra.mrb[56].mxu1 %vm607_vm2, %v599_v46 }
 0x202   : > { %845 = vmatprep.mubr.bf16.mxu1 %v2356_v0 }
 0x209   : > { %1830 = vmatmul.mubr.msk.bf16.gmra.mrb[60].mxu1 %vm607_vm2, %v600_v47 }
 0x264   : > { %v2670_v56 = vpop.f32.mrb[0].mxu1 }
 0x265   : > { %v2672_v57 = vpop.f32.mrb[1].mxu1 }
 0x266   : > { %v2674_v60 = vpop.f32.mrb[2].mxu1  ;;  %v856_v1 = vmax.f32 %v2670_v56, %v2672_v57 }
 0x267   : > { %v2678_v3 = vpop.f32.mrb[3].mxu1 }
 0x268   : > { %857 = vmax.xlane.f32.xlu0 %v856_v1  ;;  %v859_v4 = vmax.f32 %v2674_v60, %v2678_v3 }
 0x26a   : > { %860 = vmax.xlane.f32.xlu1 %v859_v4 }
 0x26c   : > { %v2682_v5 = vpop.f32.mrb[4].mxu1 }
 0x26d   : > { %v2684_v0 = vpop.f32.mrb[5].mxu1 }
 0x26e   : > { %v2686_v8 = vpop.f32.mrb[6].mxu1  ;;  %v862_v9 = vmax.f32 %v2682_v5, %v2684_v0 }
 0x26f   : > { %v2690_v14 = vpop.f32.mrb[7].mxu1 }
 0x270   : > { %863 = vmax.xlane.f32.xlu0 %v862_v9  ;;  %v865_v15 = vmax.f32 %v2686_v8, %v2690_v14 }
 0x274   : > { %866 = vmax.xlane.f32.xlu0 %v865_v15  ;;  %v2694_v16 = vpop.f32.mrb[8].mxu1 }
 0x275   : > { %v2696_v17 = vpop.f32.mrb[9].mxu1 }
 0x276   : > { %v2698_v20 = vpop.f32.mrb[10].mxu1 }
 0x277   : > { %v2702_v26 = vpop.f32.mrb[11].mxu1 }
 0x278   : > { %v871_v27 = vmax.f32 %v2698_v20, %v2702_v26 }
 0x27c   : > { %v2706_v28 = vpop.f32.mrb[12].mxu1 }
 0x27d   : > { %v2708_v29 = vpop.f32.mrb[13].mxu1 }
 0x27e   : > { %v2710_v30 = vpop.f32.mrb[14].mxu1 }
 0x27f   : > { %v2714_v32 = vpop.f32.mrb[15].mxu1 }
 0x284   : > { %v2718_v34 = vpop.f32.mrb[16].mxu1 }
 0x285   : > { %v2720_v35 = vpop.f32.mrb[17].mxu1 }
 0x286   : > { %v2722_v36 = vpop.f32.mrb[18].mxu1 }
 0x287   : > { %v2726_v38 = vpop.f32.mrb[19].mxu1 }
 0x28c   : > { %v2730_v40 = vpop.f32.mrb[20].mxu1 }
 0x28d   : > { %v2732_v41 = vpop.f32.mrb[21].mxu1 }
 0x28e   : > { %v2734_v42 = vpop.f32.mrb[22].mxu1 }
 0x28f   : > { %v2738_v44 = vpop.f32.mrb[23].mxu1 }
 0x294   : > { %v2742_v46 = vpop.f32.mrb[24].mxu1 }
 0x295   : > { %v2744_v47 = vpop.f32.mrb[25].mxu1 }
 0x296   : > { %v2746_v48 = vpop.f32.mrb[26].mxu1 }
 0x297   : > { %508 = vxpose.xlu1.c.b16.start [1/4] (short) %v500_v63, 128  ;;  %v2753_v1 = vpop.f32.mrb[27].mxu1 }
 0x298   : > { %v895_v4 = vmax.f32 %v2746_v48, %v2753_v1 }
 0x29b   : > { %509 = vxpose.xlu1.c.b16.cont [2/4] (short) %v502_v12, 128 }
 0x29c   : > { %v2760_v9 = vpop.f32.mrb[28].mxu1 }
 0x29d   : > { %v2762_v15 = vpop.f32.mrb[29].mxu1 }
 0x29e   : > { %3369 = vst [vmem:[#allocation12_spill] sm:$0xff] %v2762_v15  ;;  %v2764_v45 = vpop.f32.mrb[30].mxu1 }
 0x29f   : > { %510 = vxpose.xlu1.c.b16.cont [3/4] (short) %v504_v24, 128  ;;  %v2771_v58 = vpop.f32.mrb[31].mxu1 }
 0x2a0   : > { %v901_v59 = vmax.f32 %v2764_v45, %v2771_v58 }
 0x2a1   : > { %524 = vxpose.xlu0.c.b16.start [1/4] (short) %v501_v2, 128 }
 0x2a3   : > { %511 = vxpose.xlu1.c.b16.end [4/4] (short) %v506_v54, 128 }
 0x2a4   : > { %v2781_v63 = vpop.f32.mrb[32].mxu1 }
 0x2a5   : > { %525 = vxpose.xlu0.c.b16.cont [2/4] (short) %v503_v13, 128  ;;  %v2786_v6 = vpop.f32.mrb[33].mxu1 }
 0x2a6   : > { %v2788_v7 = vpop.f32.mrb[34].mxu1 }
 0x2a7   : > { %v2792_v18 = vpop.f32.mrb[35].mxu1 }
 0x2a8   : > { %v907_v61 = vmax.f32 %v2788_v7, %v2792_v18 }
 0x2a9   : > { %526 = vxpose.xlu0.c.b16.cont [3/4] (short) %v505_v25, 128 }
 0x2ac   : > { %v2799_v62 = vpop.f32.mrb[36].mxu1 }
 0x2ad   : > { %3370 = vst [vmem:[#allocation13_spill] sm:$0xff] %v2799_v62  ;;  %527 = vxpose.xlu0.c.b16.end [4/4] (short) %v507_v55, 128  ;;  %v2804_v2 = vpop.f32.mrb[37].mxu1 }
 0x2ae   : > { %3371 = vst [vmem:[#allocation14_spill] sm:$0xff] %v2804_v2  ;;  %v2806_v10 = vpop.f32.mrb[38].mxu1  ;;  %v910_v11 = vmax.f32 %v2799_v62, %v2804_v2 }
 0x2af   : > { %v2810_v13 = vpop.f32.mrb[39].mxu1 }
 0x2b0   : > { %v913_v19 = vmax.f32 %v2806_v10, %v2810_v13 }
 0x2b4   : > { %v2814_v22 = vpop.f32.mrb[40].mxu1 }
 0x2b5   : > { %3372 = vst [vmem:[#allocation15_spill] sm:$0xff] %v2814_v22  ;;  %v2816_v23 = vpop.f32.mrb[41].mxu1 }
 0x2b6   : > { %3373 = vst [vmem:[#allocation16_spill] sm:$0xff] %v2816_v23  ;;  %v2818_v24 = vpop.f32.mrb[42].mxu1  ;;  %v916_v25 = vmax.f32 %v2814_v22, %v2816_v23 }
 0x2b7   : > { %v2822_v50 = vpop.f32.mrb[43].mxu1 }
 0x2b8   : > { %v919_v51 = vmax.f32 %v2818_v24, %v2822_v50 }
 0x2bc   : > { %v2826_v52 = vpop.f32.mrb[44].mxu1 }
 0x2bd   : > { %3374 = vst [vmem:[#allocation17_spill] sm:$0xff] %v2826_v52  ;;  %v2828_v53 = vpop.f32.mrb[45].mxu1 }
 0x2be   : > { %3375 = vst [vmem:[#allocation18_spill] sm:$0xff] %v2828_v53  ;;  %v2830_v54 = vpop.f32.mrb[46].mxu1  ;;  %v922_v55 = vmax.f32 %v2826_v52, %v2828_v53  ;;  %v3380_v52 = vmax.f32 %v2706_v28, %v2708_v29 }
 0x2bf   : > { %v2834_v12 = vpop.f32.mrb[47].mxu1 }
 0x2c0   : > { %872 = vmax.xlane.f32.xlu1 %v871_v27  ;;  %v925_v49 = vmax.f32 %v2830_v54, %v2834_v12  ;;  %v3377_v27 = vmax.f32 %v2694_v16, %v2696_v17 }
 0x2c4   : > { %896 = vmax.xlane.f32.xlu1 %v895_v4  ;;  %v2838_v43 = vpop.f32.mrb[48].mxu1 }
 0x2c5   : > { %v2840_v39 = vpop.f32.mrb[49].mxu1 }
 0x2c6   : > { %v2842_v37 = vpop.f32.mrb[50].mxu1 }
 0x2c7   : > { %v2846_v31 = vpop.f32.mrb[51].mxu1 }
 0x2c8   : > { %3376 = vst [vmem:[#allocation19_spill] sm:$0xff] %v2846_v31  ;;  %902 = vmax.xlane.f32.xlu1 %v901_v59  ;;  %v931_v21 = vmax.f32 %v2842_v37, %v2846_v31 }
 0x2ca   : > { %869 = vmax.xlane.f32.xlu0 %v3377_v27 }
 0x2cc   : > { %908 = vmax.xlane.f32.xlu1 %v907_v61  ;;  %v2853_v4 = vpop.f32.mrb[52].mxu1  ;;  %v3381_v61 = vmax.f32 %v2710_v30, %v2714_v32 }
 0x2cd   : > { %3378 = vst [vmem:[#allocation20_spill] sm:$0xff] %v2853_v4  ;;  %v2855_v53 = vpop.f32.mrb[53].mxu1 }
 0x2ce   : > { %3379 = vst [vmem:[#allocation21_spill] sm:$0xff] %v2855_v53  ;;  %875 = vmax.xlane.f32.xlu0 %v3380_v52  ;;  %v2860_v33 = vpop.f32.mrb[54].mxu1  ;;  %v934_v59 = vmax.f32 %v2853_v4, %v2855_v53  ;;  %v3384_v52 = vmax.f32 %v2718_v34, %v2720_v35 }
 0x2cf   : > { %v2864_v23 = vpop.f32.mrb[55].mxu1 }
 0x2d0   : > { %914 = vmax.xlane.f32.xlu1 %v913_v19  ;;  %v937_v27 = vmax.f32 %v2860_v33, %v2864_v23 }
 0x2d2   : > { %878 = vmax.xlane.f32.xlu0 %v3381_v61 }
 0x2d4   : > { %920 = vmax.xlane.f32.xlu1 %v919_v51  ;;  %v2871_v22 = vpop.f32.mrb[56].mxu1  ;;  %v3386_v51 = vmax.f32 %v2722_v36, %v2726_v38 }
 0x2d5   : > { %3382 = vst [vmem:[#allocation22_spill] sm:$0xff] %v2871_v22  ;;  %v2873_v2 = vpop.f32.mrb[57].mxu1 }
 0x2d6   : > { %3383 = vst [vmem:[#allocation23_spill] sm:$0xff] %v2873_v2  ;;  %881 = vmax.xlane.f32.xlu0 %v3384_v52  ;;  %v2878_v53 = vpop.f32.mrb[58].mxu1  ;;  %v940_v19 = vmax.f32 %v2871_v22, %v2873_v2  ;;  %v3389_v52 = vmax.f32 %v2730_v40, %v2732_v41 }
 0x2d7   : > { %v2882_v4 = vpop.f32.mrb[59].mxu1 }
 0x2d8   : > { %3385 = vst [vmem:[#allocation24_spill] sm:$0xff] %v2882_v4  ;;  %926 = vmax.xlane.f32.xlu1 %v925_v49  ;;  %v943_v61 = vmax.f32 %v2878_v53, %v2882_v4  ;;  %v3393_v4 = vmax.f32 %v2742_v46, %v2744_v47 }
 0x2da   : > { %884 = vmax.xlane.f32.xlu0 %v3386_v51 }
 0x2dc   : > { %938 = vmax.xlane.f32.xlu1 %v937_v27  ;;  %v2889_v62 = vpop.f32.mrb[60].mxu1  ;;  %v3392_v27 = vmax.f32 %v2734_v42, %v2738_v44 }
 0x2dd   : > { %3387 = vst [vmem:[#allocation25_spill] sm:$0xff] %v2889_v62  ;;  %v2891_v31 = vpop.f32.mrb[61].mxu1 }
 0x2de   : > { %3388 = vst [vmem:[#allocation26_spill] sm:$0xff] %v2891_v31  ;;  %887 = vmax.xlane.f32.xlu0 %v3389_v52  ;;  %v2896_v2 = vpop.f32.mrb[62].mxu1  ;;  %v946_v49 = vmax.f32 %v2889_v62, %v2891_v31  ;;  %v3394_v52 = vmax.f32 %v2760_v9, %v2762_v15 }
 0x2df   : > { %3390 = vst [vmem:[#allocation27_spill] sm:$0xff] %v2896_v2  ;;  %v2900_v22 = vpop.f32.mrb[63].mxu1 }
 0x2e0   : > { %3391 = vst [vmem:[#allocation28_spill] sm:$0xff] %v2900_v22  ;;  %932 = vmax.xlane.f32.xlu1 %v931_v21  ;;  %v949_v51 = vmax.f32 %v2896_v2, %v2900_v22  ;;  %v3395_v21 = vmax.f32 %v2781_v63, %v2786_v6 }
 0x2e2   : > { %890 = vmax.xlane.f32.xlu0 %v3392_v27 }
 0x2e4   : > { %944 = vmax.xlane.f32.xlu1 %v943_v61 }
 0x2e6   : > { %893 = vmax.xlane.f32.xlu0 %v3393_v4 }
 0x2e8   : > { %950 = vmax.xlane.f32.xlu1 %v949_v51 }
 0x2ea   : > { %899 = vmax.xlane.f32.xlu0 %v3394_v52 }
 0x2ee   : > { %905 = vmax.xlane.f32.xlu0 %v3395_v21 }
 0x2f2   : > { %911 = vmax.xlane.f32.xlu0 %v910_v11 }
 0x2f5   : > { %v858_v31 = vpop.xlane.xlu0 %857 }
 0x2f6   : > { %v952_v62 = vsub.f32 %v2670_v56, %v858_v31  ;;  %v953_v27 = vsub.f32 %v2672_v57, %v858_v31  ;;  %917 = vmax.xlane.f32.xlu0 %v916_v25 }
 0x2f7   : > { %v861_v61 = vpop.xlane.xlu1 %860 }
 0x2f8   : > { %v1016_v22 = vmul.f32 1.442695, %v952_v62  ;;  %v1018_v2 = vmul.f32 1.442695, %v953_v27  ;;  %v954_v4 = vsub.f32 %v2674_v60, %v861_v61  ;;  %v955_v51 = vsub.f32 %v2678_v3, %v861_v61 }
 0x2fa   : > { %2047 = vpow2.f32 %v1016_v22  ;;  %v1020_v52 = vmul.f32 1.442695, %v954_v4  ;;  %v1022_v15 = vmul.f32 1.442695, %v955_v51  ;;  %923 = vmax.xlane.f32.xlu0 %v922_v55 }
 0x2fb   : > { %2049 = vpow2.f32 %v1018_v2 }
 0x2fc   : > { %2051 = vpow2.f32 %v1020_v52 }
 0x2fd   : > { %2053 = vpow2.f32 %v1022_v15  ;;  %v864_v11 = vpop.xlane.xlu0 %863  ;;  %v516_v21 = vpop.trf.xlu1  ;;  %v3396_v15 = vmax.f32 %v2838_v43, %v2840_v39 }
 0x2fe   : > { %v956_v56 = vsub.f32 %v2682_v5, %v864_v11  ;;  %v957_v57 = vsub.f32 %v2684_v0, %v864_v11  ;;  %935 = vmax.xlane.f32.xlu0 %v934_v59  ;;  %540 = vst.msk [vmem:[#allocation4] sm:$0xff] %vm383_vm0, %v516_v21 }
 0x300   : > { %v1024_v31 = vmul.f32 1.442695, %v956_v56  ;;  %v1026_v60 = vmul.f32 1.442695, %v957_v57 }
 0x301   : > { %v867_v62 = vpop.xlane.xlu0 %866  ;;  %v517_v3 = vpop.trf.xlu1 }
 0x302   : > { %2055 = vpow2.f32 %v1024_v31  ;;  %v958_v22 = vsub.f32 %v2686_v8, %v867_v62  ;;  %v959_v2 = vsub.f32 %v2690_v14, %v867_v62  ;;  %929 = vmax.xlane.f32.xlu0 %v3396_v15  ;;  %541 = vst.msk [vmem:[#allocation4 + $0x8] sm:$0xff] %vm383_vm0, %v517_v3 }
 0x303   : > { %2057 = vpow2.f32 %v1026_v60 }
 0x304   : > { %v2929_v5 = vpop.eup %2047  ;;  %v1028_v0 = vmul.f32 1.442695, %v958_v22  ;;  %v1030_v25 = vmul.f32 1.442695, %v959_v2 }
 0x305   : > { %v2050_v55 = vpop.eup %2049  ;;  %v518_v59 = vpop.trf.xlu1  ;;  %v1272_v31 = vld [vmem:[#allocation4] sm:$0xff] }
 0x306   : > { %v2931_v27 = vpop.eup %2051  ;;  %2059 = vpow2.f32 %v1028_v0  ;;  %941 = vmax.xlane.f32.xlu0 %v940_v19  ;;  %v1144_v8 = vadd.f32 %v2050_v55, %v2929_v5  ;;  %542 = vst.msk [vmem:[#allocation4 + $0x10] sm:$0xff] %vm383_vm0, %v518_v59 }
 0x307   : > { %v2054_v14 = vpop.eup %2053  ;;  %2061 = vpow2.f32 %v1030_v25  ;;  %v532_v61 = vpop.trf.xlu0  ;;  %v1240_v4 = vpack.c.bf16 %v2931_v27, %v2929_v5 }
 0x308   : > { %548 = vst.msk [vmem:[#allocation4 + $0x40] sm:$0xff] %vm383_vm0, %v532_v61  ;;  %v1241_v51 = vpack.c.bf16 %v2054_v14, %v2050_v55  ;;  %v1147_v52 = vadd.f32 %v2054_v14, %v2931_v27 }
 0x309   : > { %v519_v11 = vpop.trf.xlu1  ;;  %v1273_v0 = vld [vmem:[#allocation4 + $0x8] sm:$0xff] }
 0x30a   : > { %1320 = vmatprep.mubr.bf16.mxu0 %v1241_v51  ;;  %947 = vmax.xlane.f32.xlu0 %v946_v49  ;;  %543 = vst.msk [vmem:[#allocation4 + $0x18] sm:$0xff] %vm383_vm0, %v519_v11 }
 0x30b   : > { %v533_v19 = vpop.trf.xlu0 }
 0x30c   : > { %v2940_v21 = vpop.eup %2055  ;;  %549 = vst.msk [vmem:[#allocation4 + $0x48] sm:$0xff] %vm383_vm0, %v533_v19 }
 0x30d   : > { %v2943_v56 = vpop.eup %2057  ;;  %v520_v57 = vpop.trf.xlu1  ;;  %v1274_v61 = vld [vmem:[#allocation4 + $0x10] sm:$0xff] }
 0x30e   : > { %1145 = vadd.xlane.f32.xlu0 %v1144_v8  ;;  %v1150_v60 = vadd.f32 %v2943_v56, %v2940_v21  ;;  %544 = vst.msk [vmem:[#allocation4 + $0x20] sm:$0xff] %vm383_vm0, %v520_v57 }
 0x30f   : > { %v534_v62 = vpop.trf.xlu0  ;;  %v1280_v3 = vld [vmem:[#allocation4 + $0x40] sm:$0xff] }
 0x310   : > { %v2948_v49 = vpop.eup %2059  ;;  %550 = vst.msk [vmem:[#allocation4 + $0x50] sm:$0xff] %vm383_vm0, %v534_v62  ;;  %1845 = vmatprep.subr.bf16.mxu0 %v1280_v3  ;;  %1957 = vmatprep.subr.bf16.mxu1 %v1280_v3 }
 0x311   : > { %v2951_v22 = vpop.eup %2061  ;;  %1846 = vmatpush3.bf16.msra.mxu0 %v1272_v31  ;;  %v521_v2 = vpop.trf.xlu1  ;;  %1965 = vmatpush3.bf16.msra.mxu1 %v1272_v31  ;;  %v1242_v15 = vpack.c.bf16 %v2948_v49, %v2940_v21  ;;  %v1275_v19 = vld [vmem:[#allocation4 + $0x18] sm:$0xff] }
 0x312   : > { %1148 = vadd.xlane.f32.xlu0 %v1147_v52  ;;  %v1153_v25 = vadd.f32 %v2951_v22, %v2948_v49  ;;  %545 = vst.msk [vmem:[#allocation4 + $0x28] sm:$0xff] %vm383_vm0, %v521_v2  ;;  %v1243_v55 = vpack.c.bf16 %v2951_v22, %v2943_v56 }
 0x313   : > { %v535_v59 = vpop.trf.xlu0  ;;  %v1281_v8 = vld [vmem:[#allocation4 + $0x48] sm:$0xff] }
 0x314   : > { %551 = vst.msk [vmem:[#allocation4 + $0x58] sm:$0xff] %vm383_vm0, %v535_v59  ;;  %1847 = vmatprep.subr.bf16.mxu0 %v1281_v8  ;;  %1958 = vmatprep.subr.bf16.mxu1 %v1281_v8 }
 0x315   : > { %1848 = vmatpush3.bf16.msra.mxu0 %v1273_v0  ;;  %v522_v14 = vpop.trf.xlu1  ;;  %1966 = vmatpush3.bf16.msra.mxu1 %v1273_v0  ;;  %v1276_v31 = vld [vmem:[#allocation4 + $0x20] sm:$0xff] }
 0x316   : > { %1151 = vadd.xlane.f32.xlu0 %v1150_v60  ;;  %546 = vst.msk [vmem:[#allocation4 + $0x30] sm:$0xff] %vm383_vm0, %v522_v14 }
 0x317   : > { %v536_v51 = vpop.trf.xlu0  ;;  %v1282_v52 = vld [vmem:[#allocation4 + $0x50] sm:$0xff] }
 0x318   : > { %552 = vst.msk [vmem:[#allocation4 + $0x60] sm:$0xff] %vm383_vm0, %v536_v51  ;;  %1849 = vmatprep.subr.bf16.mxu0 %v1282_v52  ;;  %1959 = vmatprep.subr.bf16.mxu1 %v1282_v52 }
 0x319   : > { %1850 = vmatpush3.bf16.msra.mxu0 %v1274_v61  ;;  %v523_v11 = vpop.trf.xlu1  ;;  %1967 = vmatpush3.bf16.msra.mxu1 %v1274_v61  ;;  %v1277_v3 = vld [vmem:[#allocation4 + $0x28] sm:$0xff] }
 0x31a   : > { %1154 = vadd.xlane.f32.xlu0 %v1153_v25  ;;  %547 = vst.msk [vmem:[#allocation4 + $0x38] sm:$0xff] %vm383_vm0, %v523_v11 }
 0x31b   : > { %v537_v56 = vpop.trf.xlu0  ;;  %v1283_v57 = vld [vmem:[#allocation4 + $0x58] sm:$0xff] }
 0x31c   : > { %553 = vst.msk [vmem:[#allocation4 + $0x68] sm:$0xff] %vm383_vm0, %v537_v56  ;;  %1851 = vmatprep.subr.bf16.mxu0 %v1283_v57  ;;  %1960 = vmatprep.subr.bf16.mxu1 %v1283_v57 }
 0x31d   : > { %1852 = vmatpush3.bf16.msra.mxu0 %v1275_v19  ;;  %1968 = vmatpush3.bf16.msra.mxu1 %v1275_v19  ;;  %v1278_v0 = vld [vmem:[#allocation4 + $0x30] sm:$0xff] }
 0x31f   : > { %v538_v60 = vpop.trf.xlu0  ;;  %v1284_v62 = vld [vmem:[#allocation4 + $0x60] sm:$0xff] }
 0x320   : > { %554 = vst.msk [vmem:[#allocation4 + $0x70] sm:$0xff] %vm383_vm0, %v538_v60  ;;  %1853 = vmatprep.subr.bf16.mxu0 %v1284_v62  ;;  %1961 = vmatprep.subr.bf16.mxu1 %v1284_v62 }
 0x321   : > { %1854 = vmatpush3.bf16.msra.mxu0 %v1276_v31  ;;  %1969 = vmatpush3.bf16.msra.mxu1 %v1276_v31  ;;  %v1279_v59 = vld [vmem:[#allocation4 + $0x38] sm:$0xff] }
 0x323   : > { %v539_v22 = vpop.trf.xlu0  ;;  %v1285_v2 = vld [vmem:[#allocation4 + $0x68] sm:$0xff] }
 0x324   : > { %555 = vst.msk [vmem:[#allocation4 + $0x78] sm:$0xff] %vm383_vm0, %v539_v22  ;;  %1855 = vmatprep.subr.bf16.mxu0 %v1285_v2  ;;  %1962 = vmatprep.subr.bf16.mxu1 %v1285_v2 }
 0x325   : > { %1856 = vmatpush3.bf16.msra.mxu0 %v1277_v3  ;;  %1970 = vmatpush3.bf16.msra.mxu1 %v1277_v3 }
 0x327   : > { %v1286_v25 = vld [vmem:[#allocation4 + $0x70] sm:$0xff] }
 0x328   : > { %1857 = vmatprep.subr.bf16.mxu0 %v1286_v25  ;;  %1963 = vmatprep.subr.bf16.mxu1 %v1286_v25 }
 0x329   : > { %1858 = vmatpush3.bf16.msra.mxu0 %v1278_v0  ;;  %1971 = vmatpush3.bf16.msra.mxu1 %v1278_v0 }
 0x32b   : > { %v1287_v8 = vld [vmem:[#allocation4 + $0x78] sm:$0xff] }
 0x32c   : > { %1859 = vmatprep.subr.bf16.mxu0 %v1287_v8  ;;  %1964 = vmatprep.subr.bf16.mxu1 %v1287_v8 }
 0x32d   : > { %1860 = vmatpush3.bf16.msra.mxu0 %v1279_v59  ;;  %1972 = vmatpush3.bf16.msra.mxu1 %v1279_v59 }
 0x330   : > { %1321 = vmatmul.mubr.bf16.vlgmr.msra.gmra.mrb[20].mxu0 %v1240_v4 }
 0x331   : > { %1328 = vmatprep.mubr.bf16.mxu0 %v1243_v55 }
 0x338   : > { %1329 = vmatmul.mubr.bf16.gmra.mrb[24].mxu0 %v1242_v15 }
 0x34d   : > { %v873_v14 = vpop.xlane.xlu1 %872 }
 0x34e   : > { %v962_v61 = vsub.f32 %v2698_v20, %v873_v14  ;;  %v963_v51 = vsub.f32 %v2702_v26, %v873_v14 }
 0x350   : > { %v1036_v52 = vmul.f32 1.442695, %v962_v61  ;;  %v1038_v11 = vmul.f32 1.442695, %v963_v51 }
 0x351   : > { %v897_v19 = vpop.xlane.xlu1 %896 }
 0x352   : > { %2063 = vpow2.f32 %v1036_v52  ;;  %v978_v56 = vsub.f32 %v2746_v48, %v897_v19  ;;  %v979_v57 = vsub.f32 %v2753_v1, %v897_v19 }
 0x353   : > { %2065 = vpow2.f32 %v1038_v11 }
 0x354   : > { %v1068_v5 = vmul.f32 1.442695, %v978_v56  ;;  %v1070_v27 = vmul.f32 1.442695, %v979_v57 }
 0x355   : > { %v903_v4 = vpop.xlane.xlu1 %902 }
 0x356   : > { %2067 = vpow2.f32 %v1068_v5  ;;  %v982_v21 = vsub.f32 %v2764_v45, %v903_v4  ;;  %v983_v49 = vsub.f32 %v2771_v58, %v903_v4 }
 0x357   : > { %2069 = vpow2.f32 %v1070_v27  ;;  %v870_v20 = vpop.xlane.xlu0 %869 }
 0x358   : > { %v1076_v26 = vmul.f32 1.442695, %v982_v21  ;;  %v1078_v15 = vmul.f32 1.442695, %v983_v49  ;;  %v960_v55 = vsub.f32 %v2694_v16, %v870_v20  ;;  %v961_v31 = vsub.f32 %v2696_v17, %v870_v20 }
 0x359   : > { %v909_v48 = vpop.xlane.xlu1 %908 }
 0x35a   : > { %2071 = vpow2.f32 %v1076_v26  ;;  %v1032_v1 = vmul.f32 1.442695, %v960_v55  ;;  %v1034_v60 = vmul.f32 1.442695, %v961_v31  ;;  %v986_v62 = vsub.f32 %v2788_v7, %v909_v48 }
 0x35b   : > { %2073 = vpow2.f32 %v1078_v15  ;;  %v987_v3 = vsub.f32 %v2792_v18, %v909_v48  ;;  %v876_v45 = vpop.xlane.xlu0 %875 }
 0x35c   : > { %v2983_v22 = vpop.eup %2063  ;;  %2075 = vpow2.f32 %v1032_v1  ;;  %v1084_v58 = vmul.f32 1.442695, %v986_v62  ;;  %v964_v2 = vsub.f32 %v2706_v28, %v876_v45  ;;  %v965_v16 = vsub.f32 %v2708_v29, %v876_v45 }
 0x35d   : > { %v2987_v0 = vpop.eup %2065  ;;  %2077 = vpow2.f32 %v1034_v60  ;;  %v1086_v17 = vmul.f32 1.442695, %v987_v3  ;;  %v915_v25 = vpop.xlane.xlu1 %914 }
 0x35e   : > { %2079 = vpow2.f32 %v1084_v58  ;;  %v1040_v59 = vmul.f32 1.442695, %v964_v2  ;;  %v1042_v7 = vmul.f32 1.442695, %v965_v16  ;;  %v990_v8 = vsub.f32 %v2806_v10, %v915_v25 }
 0x35f   : > { %2081 = vpow2.f32 %v1086_v17  ;;  %v991_v18 = vsub.f32 %v2810_v13, %v915_v25  ;;  %v879_v14 = vpop.xlane.xlu0 %878  ;;  %v2993_v61 = vadd.f32 %v2987_v0, %v2983_v22 }
 0x360   : > { %v2995_v28 = vpop.eup %2067  ;;  %2083 = vpow2.f32 %v1040_v59  ;;  %v1092_v29 = vmul.f32 1.442695, %v990_v8  ;;  %v966_v51 = vsub.f32 %v2710_v30, %v879_v14  ;;  %v967_v52 = vsub.f32 %v2714_v32, %v879_v14 }
 0x361   : > { %v2999_v11 = vpop.eup %2069  ;;  %2085 = vpow2.f32 %v1042_v7  ;;  %v1094_v10 = vmul.f32 1.442695, %v991_v18  ;;  %v921_v19 = vpop.xlane.xlu1 %920 }
 0x362   : > { %2087 = vpow2.f32 %v1092_v29  ;;  %v1044_v13 = vmul.f32 1.442695, %v966_v51  ;;  %v1046_v56 = vmul.f32 1.442695, %v967_v52  ;;  %v994_v57 = vsub.f32 %v2818_v24, %v921_v19 }
 0x363   : > { %2089 = vpow2.f32 %v1094_v10  ;;  %v995_v5 = vsub.f32 %v2822_v50, %v921_v19  ;;  %v882_v27 = vpop.xlane.xlu0 %881  ;;  %v3005_v4 = vadd.f32 %v2999_v11, %v2995_v28 }
 0x364   : > { %v3007_v30 = vpop.eup %2071  ;;  %2091 = vpow2.f32 %v1044_v13  ;;  %v1100_v32 = vmul.f32 1.442695, %v994_v57  ;;  %v968_v21 = vsub.f32 %v2718_v34, %v882_v27  ;;  %v969_v49 = vsub.f32 %v2720_v35, %v882_v27  ;;  %v3397_v27 = vld [vmem:[#allocation19_spill] sm:$0xff] }
 0x365   : > { %v3011_v20 = vpop.eup %2073  ;;  %2093 = vpow2.f32 %v1046_v56  ;;  %v1102_v24 = vmul.f32 1.442695, %v995_v5  ;;  %v927_v26 = vpop.xlane.xlu1 %926 }
 0x366   : > { %v2076_v15 = vpop.eup %2075  ;;  %2095 = vpow2.f32 %v1100_v32  ;;  %v1048_v50 = vmul.f32 1.442695, %v968_v21  ;;  %v1050_v55 = vmul.f32 1.442695, %v969_v49  ;;  %v998_v31 = vsub.f32 %v2830_v54, %v927_v26 }
 0x367   : > { %v2078_v48 = vpop.eup %2077  ;;  %2097 = vpow2.f32 %v1102_v24  ;;  %v999_v1 = vsub.f32 %v2834_v12, %v927_v26  ;;  %v885_v60 = vpop.xlane.xlu0 %884  ;;  %v1244_v34 = vpack.c.bf16 %v2983_v22, %v2076_v15  ;;  %v3018_v35 = vadd.f32 %v3011_v20, %v3007_v30 }
 0x368   : > { %v3020_v62 = vpop.eup %2079  ;;  %2099 = vpow2.f32 %v1048_v50  ;;  %v1108_v3 = vmul.f32 1.442695, %v998_v31  ;;  %v970_v45 = vsub.f32 %v2722_v36, %v885_v60  ;;  %v971_v58 = vsub.f32 %v2726_v38, %v885_v60 }
 0x369   : > { %v3024_v54 = vpop.eup %2081  ;;  %2101 = vpow2.f32 %v1050_v55  ;;  %v1110_v2 = vmul.f32 1.442695, %v999_v1  ;;  %v1156_v12 = vadd.f32 %v2078_v48, %v2076_v15  ;;  %v1245_v16 = vpack.c.bf16 %v2987_v0, %v2078_v48  ;;  %v939_v22 = vpop.xlane.xlu1 %938 }
 0x36a   : > { %v2084_v17 = vpop.eup %2083  ;;  %2103 = vpow2.f32 %v1108_v3  ;;  %v1052_v25 = vmul.f32 1.442695, %v970_v45  ;;  %v1054_v59 = vmul.f32 1.442695, %v971_v58  ;;  %v1006_v7 = vsub.f32 %v2860_v33, %v939_v22 }
 0x36b   : > { %v2086_v8 = vpop.eup %2085  ;;  %2105 = vpow2.f32 %v1110_v2  ;;  %1157 = vadd.xlane.f32.xlu0 %v1156_v12  ;;  %1336 = vmatprep.mubr.bf16.mxu0 %v1245_v16  ;;  %v1007_v36 = vsub.f32 %v2864_v23, %v939_v22  ;;  %v888_v38 = vpop.xlane.xlu0 %887  ;;  %v3031_v18 = vadd.f32 %v3024_v54, %v3020_v62 }
 0x36c   : > { %v3033_v14 = vpop.eup %2087  ;;  %2107 = vpow2.f32 %v1052_v25  ;;  %v1124_v0 = vmul.f32 1.442695, %v1006_v7  ;;  %1337 = vmatmul.mubr.bf16.gmra.mrb[28].mxu0 %v1244_v34  ;;  %v972_v29 = vsub.f32 %v2730_v40, %v888_v38  ;;  %v973_v33 = vsub.f32 %v2732_v41, %v888_v38  ;;  %v3399_v38 = vld [vmem:[#allocation27_spill] sm:$0xff] }
 0x36d   : > { %v3037_v51 = vpop.eup %2089  ;;  %2109 = vpow2.f32 %v1054_v59  ;;  %v1126_v52 = vmul.f32 1.442695, %v1007_v36  ;;  %v933_v10 = vpop.xlane.xlu1 %932  ;;  %v1162_v23 = vadd.f32 %v2086_v8, %v2084_v17 }
 0x36e   : > { %v2092_v19 = vpop.eup %2091  ;;  %2111 = vpow2.f32 %v1124_v0  ;;  %v1056_v13 = vmul.f32 1.442695, %v972_v29  ;;  %v1058_v56 = vmul.f32 1.442695, %v973_v33  ;;  %v1002_v57 = vsub.f32 %v2842_v37, %v933_v10  ;;  %v3400_v33 = vld [vmem:[#allocation28_spill] sm:$0xff] }
 0x36f   : > { %v2094_v5 = vpop.eup %2093  ;;  %2113 = vpow2.f32 %v1126_v52  ;;  %1160 = vadd.xlane.f32.xlu0 %v2993_v61  ;;  %v1003_v40 = vsub.f32 %v3397_v27, %v933_v10  ;;  %v891_v32 = vpop.xlane.xlu0 %890  ;;  %v1246_v41 = vpack.c.bf16 %v2092_v19, %v2084_v17  ;;  %v3044_v21 = vadd.f32 %v3037_v51, %v3033_v14 }
 0x370   : > { %v3046_v49 = vpop.eup %2095  ;;  %2115 = vpow2.f32 %v1056_v13  ;;  %v1116_v24 = vmul.f32 1.442695, %v1002_v57  ;;  %v974_v26 = vsub.f32 %v2734_v42, %v891_v32  ;;  %v975_v37 = vsub.f32 %v2738_v44, %v891_v32  ;;  %v3398_v42 = vld [vmem:[#allocation24_spill] sm:$0xff] }
 0x371   : > { %v3050_v15 = vpop.eup %2097  ;;  %2117 = vpow2.f32 %v1058_v56  ;;  %v1118_v61 = vmul.f32 1.442695, %v1003_v40  ;;  %v1247_v50 = vpack.c.bf16 %v2094_v5, %v2086_v8  ;;  %v945_v55 = vpop.xlane.xlu1 %944  ;;  %v1165_v31 = vadd.f32 %v2094_v5, %v2092_v19  ;;  %v3401_v56 = vld [vmem:[#allocation12_spill] sm:$0xff] }
 0x372   : > { %v2100_v48 = vpop.eup %2099  ;;  %2119 = vpow2.f32 %v1116_v24  ;;  %v1060_v1 = vmul.f32 1.442695, %v974_v26  ;;  %v1062_v60 = vmul.f32 1.442695, %v975_v37  ;;  %v1010_v34 = vsub.f32 %v2878_v53, %v945_v55 }
 0x373   : > { %v2102_v3 = vpop.eup %2101  ;;  %2121 = vpow2.f32 %v1118_v61  ;;  %1344 = vmatprep.mubr.bf16.mxu0 %v1247_v50  ;;  %1163 = vadd.xlane.f32.xlu0 %v1162_v23  ;;  %v1011_v45 = vsub.f32 %v3398_v42, %v945_v55  ;;  %v894_v44 = vpop.xlane.xlu0 %893  ;;  %v3056_v58 = vadd.f32 %v3050_v15, %v3046_v49 }
 0x374   : > { %v3058_v2 = vpop.eup %2103  ;;  %2123 = vpow2.f32 %v1060_v1  ;;  %v1132_v12 = vmul.f32 1.442695, %v1010_v34  ;;  %1345 = vmatmul.mubr.bf16.gmra.mrb[32].mxu0 %v1246_v41  ;;  %v976_v16 = vsub.f32 %v2742_v46, %v894_v44  ;;  %v977_v53 = vsub.f32 %v2744_v47, %v894_v44 }
 0x375   : > { %v3062_v22 = vpop.eup %2105  ;;  %2125 = vpow2.f32 %v1062_v60  ;;  %v1134_v17 = vmul.f32 1.442695, %v1011_v45  ;;  %v951_v25 = vpop.xlane.xlu1 %950  ;;  %v1168_v59 = vadd.f32 %v2102_v3, %v2100_v48 }
 0x376   : > { %v2108_v7 = vpop.eup %2107  ;;  %2127 = vpow2.f32 %v1132_v12  ;;  %v1064_v8 = vmul.f32 1.442695, %v976_v16  ;;  %v1066_v36 = vmul.f32 1.442695, %v977_v53  ;;  %v1014_v0 = vsub.f32 %v3399_v38, %v951_v25  ;;  %v3403_v53 = vld [vmem:[#allocation14_spill] sm:$0xff] }
 0x377   : > { %v2110_v29 = vpop.eup %2109  ;;  %2129 = vpow2.f32 %v1134_v17  ;;  %1166 = vadd.xlane.f32.xlu0 %v1165_v31  ;;  %v1015_v52 = vsub.f32 %v3400_v33, %v951_v25  ;;  %v900_v46 = vpop.xlane.xlu0 %899  ;;  %v1248_v10 = vpack.c.bf16 %v2108_v7, %v2100_v48  ;;  %v3068_v47 = vadd.f32 %v3062_v22, %v3058_v2 }
 0x378   : > { %v3070_v23 = vpop.eup %2111  ;;  %2131 = vpow2.f32 %v1064_v8  ;;  %v1140_v19 = vmul.f32 1.442695, %v1014_v0  ;;  %v980_v13 = vsub.f32 %v2760_v9, %v900_v46  ;;  %v981_v57 = vsub.f32 %v3401_v56, %v900_v46 }
 0x379   : > { %v3074_v5 = vpop.eup %2113  ;;  %2133 = vpow2.f32 %v1066_v36  ;;  %v1142_v27 = vmul.f32 1.442695, %v1015_v52  ;;  %v1249_v40 = vpack.c.bf16 %v2110_v29, %v2102_v3  ;;  %v1171_v32 = vadd.f32 %v2110_v29, %v2108_v7 }
 0x37a   : > { %v2116_v41 = vpop.eup %2115  ;;  %2135 = vpow2.f32 %v1140_v19  ;;  %v1072_v24 = vmul.f32 1.442695, %v980_v13  ;;  %v1074_v26 = vmul.f32 1.442695, %v981_v57  ;;  %v3078_v37 = vadd.f32 %v3074_v5, %v3070_v23  ;;  %v3405_v13 = vld [vmem:[#allocation16_spill] sm:$0xff] }
 0x37b   : > { %v2118_v61 = vpop.eup %2117  ;;  %2137 = vpow2.f32 %v1142_v27  ;;  %1352 = vmatprep.mubr.bf16.mxu0 %v1249_v40  ;;  %1169 = vadd.xlane.f32.xlu0 %v1168_v59  ;;  %v906_v9 = vpop.xlane.xlu0 %905 }
 0x37c   : > { %v3080_v50 = vpop.eup %2119  ;;  %2139 = vpow2.f32 %v1072_v24  ;;  %1353 = vmatmul.mubr.bf16.gmra.mrb[36].mxu0 %v1248_v10  ;;  %v984_v55 = vsub.f32 %v2781_v63, %v906_v9  ;;  %v985_v31 = vsub.f32 %v2786_v6, %v906_v9  ;;  %v1174_v48 = vadd.f32 %v2118_v61, %v2116_v41  ;;  %v3402_v63 = vld [vmem:[#allocation13_spill] sm:$0xff]  ;;  %v3404_v10 = vld [vmem:[#allocation15_spill] sm:$0xff] }
 0x37d   : > { %v3084_v1 = vpop.eup %2121  ;;  %2141 = vpow2.f32 %v1074_v26 }
 0x37e   : > { %v2124_v60 = vpop.eup %2123  ;;  %v1080_v34 = vmul.f32 1.442695, %v984_v55  ;;  %v1082_v3 = vmul.f32 1.442695, %v985_v31  ;;  %v3088_v42 = vadd.f32 %v3084_v1, %v3080_v50  ;;  %v3406_v55 = vld [vmem:[#allocation17_spill] sm:$0xff]  ;;  %v3407_v31 = vld [vmem:[#allocation18_spill] sm:$0xff] }
 0x37f   : > { %v2126_v45 = vpop.eup %2125  ;;  %1172 = vadd.xlane.f32.xlu0 %v1171_v32  ;;  %v912_v44 = vpop.xlane.xlu0 %911  ;;  %v1250_v12 = vpack.c.bf16 %v2124_v60, %v2116_v41 }
 0x380   : > { %v3090_v16 = vpop.eup %2127  ;;  %2143 = vpow2.f32 %v1080_v34  ;;  %v988_v6 = vsub.f32 %v3402_v63, %v912_v44  ;;  %v989_v17 = vsub.f32 %v3403_v53, %v912_v44  ;;  %v1251_v25 = vpack.c.bf16 %v2126_v45, %v2118_v61 }
 0x381   : > { %v3094_v59 = vpop.eup %2129  ;;  %2145 = vpow2.f32 %v1082_v3  ;;  %v1177_v7 = vadd.f32 %v2126_v45, %v2124_v60 }
 0x382   : > { %v2132_v8 = vpop.eup %2131  ;;  %v1088_v36 = vmul.f32 1.442695, %v988_v6  ;;  %v1090_v38 = vmul.f32 1.442695, %v989_v17  ;;  %1360 = vmatprep.mubr.bf16.mxu0 %v1251_v25  ;;  %v3098_v0 = vadd.f32 %v3094_v59, %v3090_v16  ;;  %v3409_v17 = vld [vmem:[#allocation21_spill] sm:$0xff] }
 0x383   : > { %v2134_v29 = vpop.eup %2133  ;;  %1175 = vadd.xlane.f32.xlu0 %v1174_v48  ;;  %v918_v33 = vpop.xlane.xlu0 %917  ;;  %v1252_v52 = vpack.c.bf16 %v2995_v28, %v2132_v8 }
 0x384   : > { %v3101_v46 = vpop.eup %2135  ;;  %2147 = vpow2.f32 %v1088_v36  ;;  %1361 = vmatmul.mubr.bf16.gmra.mrb[40].mxu0 %v1250_v12  ;;  %v992_v19 = vsub.f32 %v3404_v10, %v918_v33  ;;  %v993_v56 = vsub.f32 %v3405_v13, %v918_v33  ;;  %v1253_v57 = vpack.c.bf16 %v2999_v11, %v2134_v29 }
 0x385   : > { %v3106_v27 = vpop.eup %2137  ;;  %2149 = vpow2.f32 %v1090_v38  ;;  %v1180_v40 = vadd.f32 %v2134_v29, %v2132_v8 }
 0x386   : > { %v2140_v32 = vpop.eup %2139  ;;  %v1096_v41 = vmul.f32 1.442695, %v992_v19  ;;  %v1098_v24 = vmul.f32 1.442695, %v993_v56  ;;  %1368 = vmatprep.mubr.bf16.mxu0 %v1253_v57  ;;  %v3110_v28 = vadd.f32 %v3106_v27, %v3101_v46 }
 0x387   : > { %v2142_v26 = vpop.eup %2141  ;;  %1178 = vadd.xlane.f32.xlu0 %v1177_v7  ;;  %v924_v61 = vpop.xlane.xlu0 %923  ;;  %v1254_v9 = vpack.c.bf16 %v3007_v30, %v2140_v32  ;;  %v3408_v30 = vld [vmem:[#allocation20_spill] sm:$0xff] }
 0x388   : > { %2151 = vpow2.f32 %v1096_v41  ;;  %v996_v11 = vsub.f32 %v3406_v55, %v924_v61  ;;  %v997_v48 = vsub.f32 %v3407_v31, %v924_v61  ;;  %v1255_v60 = vpack.c.bf16 %v3011_v20, %v2142_v26 }
 0x389   : > { %2153 = vpow2.f32 %v1098_v24  ;;  %v1186_v34 = vadd.f32 %v2142_v26, %v2140_v32  ;;  %v3411_v32 = vld [vmem:[#allocation23_spill] sm:$0xff] }
 0x38a   : > { %v3116_v3 = vpop.eup %2143  ;;  %v1104_v45 = vmul.f32 1.442695, %v996_v11  ;;  %v1106_v44 = vmul.f32 1.442695, %v997_v48  ;;  %v3412_v11 = vld [vmem:[#allocation25_spill] sm:$0xff]  ;;  %v3413_v48 = vld [vmem:[#allocation26_spill] sm:$0xff] }
 0x38b   : > { %v2146_v12 = vpop.eup %2145  ;;  %1181 = vadd.xlane.f32.xlu0 %v1180_v40  ;;  %v936_v63 = vpop.xlane.xlu0 %935  ;;  %v1256_v6 = vpack.c.bf16 %v3020_v62, %v3116_v3 }
 0x38c   : > { %2155 = vpow2.f32 %v1104_v45  ;;  %1369 = vmatmul.mubr.bf16.gmra.mrb[44].mxu0 %v1252_v52  ;;  %v1004_v53 = vsub.f32 %v3408_v30, %v936_v63  ;;  %v1005_v25 = vsub.f32 %v3409_v17, %v936_v63  ;;  %v1192_v20 = vadd.f32 %v2146_v12, %v3116_v3 }
 0x38d   : > { %2157 = vpow2.f32 %v1106_v44  ;;  %1376 = vmatprep.mubr.bf16.mxu0 %v1255_v60  ;;  %v1257_v7 = vpack.c.bf16 %v3024_v54, %v2146_v12 }
 0x38e   : > { %v3124_v8 = vpop.eup %2147  ;;  %v1120_v36 = vmul.f32 1.442695, %v1004_v53  ;;  %v1122_v38 = vmul.f32 1.442695, %v1005_v25  ;;  %1193 = vadd.xlane.f32.xlu1 %v1192_v20 }
 0x38f   : > { %v2150_v29 = vpop.eup %2149  ;;  %1184 = vadd.xlane.f32.xlu0 %v3005_v4  ;;  %v930_v62 = vpop.xlane.xlu0 %929  ;;  %v1258_v33 = vpack.c.bf16 %v3033_v14, %v3124_v8 }
 0x390   : > { %2159 = vpow2.f32 %v1120_v36  ;;  %v1000_v52 = vsub.f32 %v2838_v43, %v930_v62  ;;  %v1001_v10 = vsub.f32 %v2840_v39, %v930_v62  ;;  %v1198_v19 = vadd.f32 %v2150_v29, %v3124_v8  ;;  %v3410_v39 = vld [vmem:[#allocation22_spill] sm:$0xff] }
 0x391   : > { %2161 = vpow2.f32 %v1122_v38  ;;  %v1259_v54 = vpack.c.bf16 %v3037_v51, %v2150_v29 }
 0x392   : > { %v3133_v13 = vpop.eup %2151  ;;  %v1112_v56 = vmul.f32 1.442695, %v1000_v52  ;;  %v1114_v57 = vmul.f32 1.442695, %v1001_v10  ;;  %1196 = vadd.xlane.f32.xlu1 %v3031_v18 }
 0x393   : > { %v2154_v4 = vpop.eup %2153  ;;  %1187 = vadd.xlane.f32.xlu0 %v1186_v34  ;;  %v942_v40 = vpop.xlane.xlu0 %941  ;;  %v1260_v14 = vpack.c.bf16 %v3046_v49, %v3133_v13 }
 0x394   : > { %2163 = vpow2.f32 %v1112_v56  ;;  %1377 = vmatmul.mubr.bf16.gmra.mrb[48].mxu0 %v1254_v9  ;;  %v1008_v43 = vsub.f32 %v3410_v39, %v942_v40  ;;  %v1009_v41 = vsub.f32 %v3411_v32, %v942_v40  ;;  %v1204_v51 = vadd.f32 %v2154_v4, %v3133_v13 }
 0x395   : > { %2165 = vpow2.f32 %v1114_v57  ;;  %1384 = vmatprep.mubr.bf16.mxu0 %v1257_v7  ;;  %v1261_v24 = vpack.c.bf16 %v3050_v15, %v2154_v4 }
 0x396   : > { %v2156_v26 = vpop.eup %2155  ;;  %v1128_v18 = vmul.f32 1.442695, %v1008_v43  ;;  %v1130_v61 = vmul.f32 1.442695, %v1009_v41  ;;  %1199 = vadd.xlane.f32.xlu1 %v1198_v19 }
 0x397   : > { %v2158_v55 = vpop.eup %2157  ;;  %1190 = vadd.xlane.f32.xlu0 %v3018_v35  ;;  %v948_v49 = vpop.xlane.xlu0 %947  ;;  %v1262_v9 = vpack.c.bf16 %v3058_v2, %v2156_v26 }
 0x398   : > { %2167 = vpow2.f32 %v1128_v18  ;;  %v1012_v31 = vsub.f32 %v3412_v11, %v948_v49  ;;  %v1013_v60 = vsub.f32 %v3413_v48, %v948_v49  ;;  %v1210_v34 = vadd.f32 %v2158_v55, %v2156_v26 }
 0x399   : > { %2169 = vpow2.f32 %v1130_v61  ;;  %v1263_v3 = vpack.c.bf16 %v3062_v22, %v2158_v55 }
 0x39a   : > { %v2160_v15 = vpop.eup %2159  ;;  %v1136_v45 = vmul.f32 1.442695, %v1012_v31  ;;  %v1138_v44 = vmul.f32 1.442695, %v1013_v60  ;;  %1202 = vadd.xlane.f32.xlu1 %v3044_v21 }
 0x39b   : > { %v2162_v12 = vpop.eup %2161  ;;  %v1266_v35 = vpack.c.bf16 %v3070_v23, %v2160_v15 }
 0x39c   : > { %2171 = vpow2.f32 %v1136_v45  ;;  %1385 = vmatmul.mubr.bf16.gmra.mrb[52].mxu0 %v1256_v6  ;;  %v1267_v2 = vpack.c.bf16 %v3074_v5, %v2162_v12  ;;  %v1222_v63 = vadd.f32 %v2162_v12, %v2160_v15 }
 0x39d   : > { %2173 = vpow2.f32 %v1138_v44  ;;  %1392 = vmatprep.mubr.bf16.mxu0 %v1259_v54 }
 0x39e   : > { %v2164_v30 = vpop.eup %2163  ;;  %1205 = vadd.xlane.f32.xlu1 %v1204_v51  ;;  %1424 = vmatprep.mubr.bf16.mxu1 %v1267_v2 }
 0x39f   : > { %v2166_v53 = vpop.eup %2165  ;;  %1425 = vmatmul.mubr.bf16.vlgmr.msra.gmra.mrb[64].mxu1 %v1266_v35  ;;  %v1264_v22 = vpack.c.bf16 %v3080_v50, %v2164_v30 }
 0x3a0   : > { %v1216_v17 = vadd.f32 %v2166_v53, %v2164_v30  ;;  %v1265_v21 = vpack.c.bf16 %v3084_v1, %v2166_v53 }
 0x3a2   : > { %v2168_v25 = vpop.eup %2167  ;;  %1208 = vadd.xlane.f32.xlu1 %v3056_v58  ;;  %v1146_v58 = vpop.xlane.xlu0 %1145 }
 0x3a3   : > { %v2170_v23 = vpop.eup %2169  ;;  %v1268_v6 = vpack.c.bf16 %v3090_v16, %v2168_v25  ;;  %2175 = vrcp.f32 %v1146_v58 }
 0x3a4   : > { %1393 = vmatmul.mubr.bf16.gmra.mrb[56].mxu0 %v1258_v33  ;;  %v1269_v5 = vpack.c.bf16 %v3094_v59, %v2170_v23  ;;  %v1228_v20 = vadd.f32 %v2170_v23, %v2168_v25 }
 0x3a5   : > { %1400 = vmatprep.mubr.bf16.mxu0 %v1261_v24 }
 0x3a6   : > { %v2172_v7 = vpop.eup %2171  ;;  %1211 = vadd.xlane.f32.xlu1 %v1210_v34  ;;  %1432 = vmatprep.mubr.bf16.mxu1 %v1269_v5 }
 0x3a7   : > { %v2174_v8 = vpop.eup %2173  ;;  %1433 = vmatmul.mubr.bf16.gmra.mrb[68].mxu1 %v1268_v6  ;;  %v1270_v50 = vpack.c.bf16 %v3101_v46, %v2172_v7 }
 0x3a8   : > { %v1271_v1 = vpack.c.bf16 %v3106_v27, %v2174_v8  ;;  %v1234_v36 = vadd.f32 %v2174_v8, %v2172_v7 }
 0x3aa   : > { %1214 = vadd.xlane.f32.xlu1 %v3068_v47  ;;  %1440 = vmatprep.mubr.bf16.mxu1 %v1271_v1  ;;  %v1149_v47 = vpop.xlane.xlu0 %1148 }
 0x3ab   : > { %2177 = vrcp.f32 %v1149_v47 }
 0x3ac   : > { %1401 = vmatmul.mubr.bf16.gmra.mrb[60].mxu0 %v1260_v14 }
 0x3ad   : > { %1408 = vmatprep.mubr.bf16.mxu0 %v1263_v3  ;;  %v2176_v29 = vpop.eup %2175 }
 0x3ae   : > { %1217 = vadd.xlane.f32.xlu1 %v1216_v17  ;;  %v1152_v16 = vpop.xlane.xlu0 %1151 }
 0x3af   : > { %1441 = vmatmul.mubr.bf16.gmra.mrb[72].mxu1 %v1270_v50  ;;  %2179 = vrcp.f32 %v1152_v16 }
 0x3b2   : > { %1220 = vadd.xlane.f32.xlu1 %v3088_v42  ;;  %v1155_v59 = vpop.xlane.xlu0 %1154 }
 0x3b3   : > { %2181 = vrcp.f32 %v1155_v59 }
 0x3b4   : > { %1409 = vmatmul.mubr.bf16.gmra.mrb[64].mxu0 %v1262_v9 }
 0x3b5   : > { %1416 = vmatprep.mubr.bf16.mxu0 %v1265_v21  ;;  %v2178_v33 = vpop.eup %2177 }
 0x3b6   : > { %1223 = vadd.xlane.f32.xlu1 %v1222_v63 }
 0x3b9   : > { %v2180_v4 = vpop.eup %2179 }
 0x3ba   : > { %1226 = vadd.xlane.f32.xlu1 %v3078_v37  ;;  %v3165_v37 = vld [vmem:[%s3342_s3] ss:$0 sm:$0xff] }
 0x3bc   : > { %1417 = vmatmul.mubr.bf16.gmra.mrb[68].mxu0 %v1264_v22 }
 0x3bd   : > { %v2182_v43 = vpop.eup %2181 }
 0x3be   : > { %1229 = vadd.xlane.f32.xlu1 %v1228_v20 }
 0x3c2   : > { %1232 = vadd.xlane.f32.xlu1 %v3098_v0 }
 0x3c6   : > { %1235 = vadd.xlane.f32.xlu1 %v1234_v36 }
 0x3ca   : > { %1238 = vadd.xlane.f32.xlu1 %v3110_v28 }
 0x3f8   : > { %v1158_v24 = vpop.xlane.xlu0 %1157 }
 0x3f9   : > { %2183 = vrcp.f32 %v1158_v24 }
 0x3fc   : > { %v1161_v26 = vpop.xlane.xlu0 %1160 }
 0x3fd   : > { %2185 = vrcp.f32 %v1161_v26 }
 0x400   : > { %v1164_v18 = vpop.xlane.xlu0 %1163 }
 0x401   : > { %2187 = vrcp.f32 %v1164_v18 }
 0x403   : > { %v1861_v46 = vpop.f32.mrb[20].mxu0  ;;  %v2184_v34 = vpop.eup %2183 }
 0x404   : > { %v1862_v42 = vpop.f32.mrb[21].mxu0  ;;  %v1167_v61 = vpop.xlane.xlu0 %1166 }
 0x405   : > { %v1863_v27 = vadd.f32 %v1862_v42, %v1861_v46  ;;  %v1864_v38 = vpop.f32.mrb[22].mxu0  ;;  %2189 = vrcp.f32 %v1167_v61 }
 0x406   : > { %v1865_v0 = vpop.f32.mrb[23].mxu0 }
 0x407   : > { %v1481_v28 = vmul.f32 %v2176_v29, %v1863_v27  ;;  %v1866_v62 = vadd.f32 %v1865_v0, %v1864_v38  ;;  %v2186_v44 = vpop.eup %2185 }
 0x408   : > { %v1170_v55 = vpop.xlane.xlu0 %1169 }
 0x409   : > { %v1520_v52 = vadd.f32 %v3165_v37, %v1481_v28  ;;  %v1482_v10 = vmul.f32 %v2178_v33, %v1866_v62  ;;  %2191 = vrcp.f32 %v1170_v55 }
 0x40b   : > { %v1867_v19 = vpop.f32.mrb[24].mxu0  ;;  %1571 = vxpose.xlu0.b32.start [1/16] (narrow) %v1520_v52, 64  ;;  %v1521_v13 = vadd.f32 %v3165_v37, %v1482_v10  ;;  %v2188_v25 = vpop.eup %2187 }
 0x40c   : > { %v1868_v54 = vpop.f32.mrb[25].mxu0  ;;  %v1173_v49 = vpop.xlane.xlu0 %1172 }
 0x40d   : > { %v1869_v56 = vadd.f32 %v1868_v54, %v1867_v19  ;;  %v1870_v57 = vpop.f32.mrb[26].mxu0  ;;  %2193 = vrcp.f32 %v1173_v49 }
 0x40e   : > { %v1871_v40 = vpop.f32.mrb[27].mxu0 }
 0x40f   : > { %v1483_v14 = vmul.f32 %v2180_v4, %v1869_v56  ;;  %v1872_v39 = vadd.f32 %v1871_v40, %v1870_v57  ;;  %1572 = vxpose.xlu0.b32.cont [2/16] (narrow) %v1521_v13, 64  ;;  %v2190_v7 = vpop.eup %2189 }
 0x410   : > { %v1176_v31 = vpop.xlane.xlu0 %1175 }
 0x411   : > { %v1522_v32 = vadd.f32 %v3165_v37, %v1483_v14  ;;  %v1484_v41 = vmul.f32 %v2182_v43, %v1872_v39  ;;  %2195 = vrcp.f32 %v1176_v31 }
 0x413   : > { %1573 = vxpose.xlu0.b32.cont [3/16] (narrow) %v1522_v32, 64  ;;  %v1523_v51 = vadd.f32 %v3165_v37, %v1484_v41  ;;  %v2192_v42 = vpop.eup %2191 }
 0x414   : > { %v1179_v63 = vpop.xlane.xlu0 %1178 }
 0x415   : > { %2197 = vrcp.f32 %v1179_v63 }
 0x417   : > { %1574 = vxpose.xlu0.b32.cont [4/16] (narrow) %v1523_v51, 64  ;;  %v2194_v28 = vpop.eup %2193 }
 0x418   : > { %v1182_v8 = vpop.xlane.xlu0 %1181 }
 0x419   : > { %2199 = vrcp.f32 %v1182_v8 }
 0x41b   : > { %v3171_v12 = vpop.xlane.xlu1 %1193  ;;  %v2196_v4 = vpop.eup %2195 }
 0x41c   : > { %v1185_v38 = vpop.xlane.xlu0 %1184 }
 0x41d   : > { %2201 = vrcp.f32 %v1185_v38 }
 0x41f   : > { %v3175_v6 = vpop.xlane.xlu1 %1196  ;;  %v2198_v43 = vpop.eup %2197 }
 0x420   : > { %v1188_v54 = vpop.xlane.xlu0 %1187 }
 0x421   : > { %2203 = vrcp.f32 %v1188_v54 }
 0x423   : > { %v3178_v47 = vpop.xlane.xlu1 %1199 }
 0x424   : > { %v1191_v24 = vpop.xlane.xlu0 %1190 }
 0x425   : > { %2205 = vrcp.f32 %v1191_v24 }
 0x426   : > { %2207 = vrcp.f32 %v3171_v12 }
 0x427   : > { %v1203_v52 = vpop.xlane.xlu1 %1202  ;;  %2209 = vrcp.f32 %v3175_v6 }
 0x428   : > { %2211 = vrcp.f32 %v3178_v47 }
 0x429   : > { %2213 = vrcp.f32 %v1203_v52 }
 0x42b   : > { %v3183_v32 = vpop.xlane.xlu1 %1205 }
 0x42c   : > { %2215 = vrcp.f32 %v3183_v32 }
 0x42f   : > { %v1209_v31 = vpop.xlane.xlu1 %1208 }
 0x430   : > { %2217 = vrcp.f32 %v1209_v31 }
 0x43f   : > { %v1873_v9 = vpop.f32.mrb[28].mxu0 }
 0x440   : > { %v1874_v11 = vpop.f32.mrb[29].mxu0 }
 0x441   : > { %v1875_v48 = vadd.f32 %v1874_v11, %v1873_v9  ;;  %v1876_v60 = vpop.f32.mrb[30].mxu0  ;;  %v2200_v9 = vpop.eup %2199 }
 0x442   : > { %v1877_v3 = vpop.f32.mrb[31].mxu0 }
 0x443   : > { %v1485_v15 = vmul.f32 %v2184_v34, %v1875_v48  ;;  %v1878_v45 = vadd.f32 %v1877_v3, %v1876_v60  ;;  %v2202_v34 = vpop.eup %2201 }
 0x445   : > { %v1524_v35 = vadd.f32 %v3165_v37, %v1485_v15  ;;  %v1486_v2 = vmul.f32 %v2186_v44, %v1878_v45 }
 0x447   : > { %v1879_v30 = vpop.f32.mrb[32].mxu0  ;;  %1575 = vxpose.xlu0.b32.cont [5/16] (narrow) %v1524_v35, 64  ;;  %v1525_v22 = vadd.f32 %v3165_v37, %v1486_v2  ;;  %v1212_v35 = vpop.xlane.xlu1 %1211 }
 0x448   : > { %v1880_v53 = vpop.f32.mrb[33].mxu0  ;;  %2219 = vrcp.f32 %v1212_v35 }
 0x449   : > { %v1881_v17 = vadd.f32 %v1880_v53, %v1879_v30  ;;  %v1882_v21 = vpop.f32.mrb[34].mxu0  ;;  %v2204_v53 = vpop.eup %2203 }
 0x44a   : > { %v1883_v23 = vpop.f32.mrb[35].mxu0 }
 0x44b   : > { %v1487_v5 = vmul.f32 %v2188_v25, %v1881_v17  ;;  %v1884_v20 = vadd.f32 %v1883_v23, %v1882_v21  ;;  %1576 = vxpose.xlu0.b32.cont [6/16] (narrow) %v1525_v22, 64  ;;  %v2206_v25 = vpop.eup %2205 }
 0x44d   : > { %v1526_v50 = vadd.f32 %v3165_v37, %v1487_v5  ;;  %v1488_v1 = vmul.f32 %v2190_v7, %v1884_v20  ;;  %v1215_v20 = vpop.xlane.xlu1 %1214 }
 0x44e   : > { %2221 = vrcp.f32 %v1215_v20 }
 0x44f   : > { %v1885_v36 = vpop.f32.mrb[36].mxu0  ;;  %1577 = vxpose.xlu0.b32.cont [7/16] (narrow) %v1526_v50, 64  ;;  %v1527_v16 = vadd.f32 %v3165_v37, %v1488_v1 }
 0x450   : > { %v1886_v58 = vpop.f32.mrb[37].mxu0 }
 0x451   : > { %v1887_v59 = vadd.f32 %v1886_v58, %v1885_v36  ;;  %v1888_v46 = vpop.f32.mrb[38].mxu0  ;;  %v2208_v36 = vpop.eup %2207 }
 0x452   : > { %v1889_v27 = vpop.f32.mrb[39].mxu0 }
 0x453   : > { %v1489_v29 = vmul.f32 %v2192_v42, %v1887_v59  ;;  %v1890_v0 = vadd.f32 %v1889_v27, %v1888_v46  ;;  %1578 = vxpose.xlu0.b32.cont [8/16] (narrow) %v1527_v16, 64  ;;  %v2210_v42 = vpop.eup %2209 }
 0x455   : > { %v1528_v62 = vadd.f32 %v3165_v37, %v1489_v29  ;;  %v1490_v33 = vmul.f32 %v2194_v28, %v1890_v0  ;;  %v1218_v29 = vpop.xlane.xlu1 %1217 }
 0x456   : > { %2223 = vrcp.f32 %v1218_v29 }
 0x457   : > { %v1891_v10 = vpop.f32.mrb[40].mxu0  ;;  %1579 = vxpose.xlu0.b32.cont [9/16] (narrow) %v1528_v62, 64  ;;  %v1529_v13 = vadd.f32 %v3165_v37, %v1490_v33 }
 0x458   : > { %v1892_v19 = vpop.f32.mrb[41].mxu0 }
 0x459   : > { %v1893_v56 = vadd.f32 %v1892_v19, %v1891_v10  ;;  %v1894_v57 = vpop.f32.mrb[42].mxu0 }
 0x45a   : > { %v1895_v40 = vpop.f32.mrb[43].mxu0 }
 0x45b   : > { %v1491_v14 = vmul.f32 %v2196_v4, %v1893_v56  ;;  %v1896_v39 = vadd.f32 %v1895_v40, %v1894_v57  ;;  %1580 = vxpose.xlu0.b32.cont [10/16] (narrow) %v1529_v13, 64  ;;  %v2212_v13 = vpop.eup %2211  ;;  %v1221_v4 = vpop.xlane.xlu1 %1220 }
 0x45c   : > { %2225 = vrcp.f32 %v1221_v4 }
 0x45d   : > { %v1530_v41 = vadd.f32 %v3165_v37, %v1491_v14  ;;  %v1492_v51 = vmul.f32 %v2198_v43, %v1896_v39  ;;  %v2214_v43 = vpop.eup %2213 }
 0x45f   : > { %v1897_v26 = vpop.f32.mrb[44].mxu0  ;;  %1581 = vxpose.xlu0.b32.cont [11/16] (narrow) %v1530_v41, 64  ;;  %v1531_v61 = vadd.f32 %v3165_v37, %v1492_v51 }
 0x460   : > { %v1898_v18 = vpop.f32.mrb[45].mxu0 }
 0x461   : > { %v1899_v55 = vadd.f32 %v1898_v18, %v1897_v26  ;;  %v1900_v49 = vpop.f32.mrb[46].mxu0 }
 0x462   : > { %v1901_v11 = vpop.f32.mrb[47].mxu0 }
 0x463   : > { %v1493_v48 = vmul.f32 %v2200_v9, %v1899_v55  ;;  %v1902_v60 = vadd.f32 %v1901_v11, %v1900_v49  ;;  %1582 = vxpose.xlu0.b32.cont [12/16] (narrow) %v1531_v61, 64  ;;  %v1224_v49 = vpop.xlane.xlu1 %1223 }
 0x464   : > { %2227 = vrcp.f32 %v1224_v49 }
 0x465   : > { %v1532_v3 = vadd.f32 %v3165_v37, %v1493_v48  ;;  %v1494_v15 = vmul.f32 %v2202_v34, %v1902_v60  ;;  %v2216_v48 = vpop.eup %2215 }
 0x467   : > { %v1903_v45 = vpop.f32.mrb[48].mxu0  ;;  %1583 = vxpose.xlu0.b32.cont [13/16] (narrow) %v1532_v3, 64  ;;  %v1533_v2 = vadd.f32 %v3165_v37, %v1494_v15 }
 0x468   : > { %v1904_v44 = vpop.f32.mrb[49].mxu0 }
 0x469   : > { %v1905_v63 = vadd.f32 %v1904_v44, %v1903_v45  ;;  %v1906_v30 = vpop.f32.mrb[50].mxu0  ;;  %v2218_v44 = vpop.eup %2217 }
 0x46a   : > { %v1907_v22 = vpop.f32.mrb[51].mxu0 }
 0x46b   : > { %v1495_v17 = vmul.f32 %v2204_v53, %v1905_v63  ;;  %v1908_v21 = vadd.f32 %v1907_v22, %v1906_v30  ;;  %1584 = vxpose.xlu0.b32.cont [14/16] (narrow) %v1533_v2, 64 }
 0x46d   : > { %v1534_v23 = vadd.f32 %v3165_v37, %v1495_v17  ;;  %v1496_v5 = vmul.f32 %v2206_v25, %v1908_v21  ;;  %v1227_v17 = vpop.xlane.xlu1 %1226 }
 0x46e   : > { %2229 = vrcp.f32 %v1227_v17 }
 0x46f   : > { %1585 = vxpose.xlu0.b32.cont [15/16] (narrow) %v1534_v23, 64  ;;  %v1909_v12 = vpop.f32.mrb[52].mxu0  ;;  %v1535_v8 = vadd.f32 %v3165_v37, %v1496_v5 }
 0x470   : > { %v1910_v7 = vpop.f32.mrb[53].mxu0 }
 0x471   : > { %v1911_v50 = vadd.f32 %v1910_v7, %v1909_v12  ;;  %v1912_v1 = vpop.f32.mrb[54].mxu0  ;;  %v2220_v12 = vpop.eup %2219 }
 0x472   : > { %v1913_v6 = vpop.f32.mrb[55].mxu0  ;;  %v1939_v58 = vpop.f32.mrb[64].mxu1 }
 0x473   : > { %v1497_v16 = vmul.f32 %v2208_v36, %v1911_v50  ;;  %v1914_v59 = vadd.f32 %v1913_v6, %v1912_v1  ;;  %1586 = vxpose.xlu0.b32.end [16/16] (narrow) %v1535_v8, 64  ;;  %v1940_v46 = vpop.f32.mrb[65].mxu1  ;;  %v2222_v1 = vpop.eup %2221 }
 0x474   : > { %v3194_v27 = vadd.f32 %v1940_v46, %v1939_v58  ;;  %v1942_v38 = vpop.f32.mrb[66].mxu1  ;;  %v1230_v36 = vpop.xlane.xlu1 %1229 }
 0x475   : > { %v1536_v47 = vadd.f32 %v3165_v37, %v1497_v16  ;;  %v1498_v0 = vmul.f32 %v2210_v42, %v1914_v59  ;;  %v1943_v28 = vpop.f32.mrb[67].mxu1  ;;  %v2224_v29 = vpop.eup %2223  ;;  %2231 = vrcp.f32 %v1230_v36 }
 0x476   : > { %v3197_v62 = vadd.f32 %v1943_v28, %v1942_v38 }
 0x477   : > { %v1915_v33 = vpop.f32.mrb[56].mxu0  ;;  %1603 = vxpose.xlu1.b32.start [1/16] (narrow) %v1536_v47, 64  ;;  %v1537_v10 = vadd.f32 %v3165_v37, %v1498_v0 }
 0x478   : > { %v1916_v52 = vpop.f32.mrb[57].mxu0  ;;  %v1233_v0 = vpop.xlane.xlu1 %1232 }
 0x479   : > { %v1917_v19 = vadd.f32 %v1916_v52, %v1915_v33  ;;  %v1918_v54 = vpop.f32.mrb[58].mxu0  ;;  %v2226_v52 = vpop.eup %2225  ;;  %2233 = vrcp.f32 %v1233_v0  ;;  %v1557_v0 = vld [vmem:[%s2511_s30 + $0x18] sm:$0xff] }
 0x47a   : > { %v1919_v56 = vpop.f32.mrb[59].mxu0  ;;  %v1945_v57 = vpop.f32.mrb[68].mxu1 }
 0x47b   : > { %v1499_v40 = vmul.f32 %v2212_v13, %v1917_v19  ;;  %v1920_v14 = vadd.f32 %v1919_v56, %v1918_v54  ;;  %1604 = vxpose.xlu1.b32.cont [2/16] (narrow) %v1537_v10, 64  ;;  %v1946_v39 = vpop.f32.mrb[69].mxu1  ;;  %v2228_v54 = vpop.eup %2227 }
 0x47c   : > { %v3201_v41 = vadd.f32 %v1946_v39, %v1945_v57  ;;  %v1948_v51 = vpop.f32.mrb[70].mxu1  ;;  %v1236_v13 = vpop.xlane.xlu1 %1235  ;;  %v1507_v56 = vmul.f32 %v2228_v54, %v3194_v27 }
 0x47d   : > { %v1538_v32 = vadd.f32 %v3165_v37, %v1499_v40  ;;  %v1500_v24 = vmul.f32 %v2214_v43, %v1920_v14  ;;  %v1949_v26 = vpop.f32.mrb[71].mxu1  ;;  %v2230_v4 = vpop.eup %2229  ;;  %2235 = vrcp.f32 %v1236_v13 }
 0x47e   : > { %v3204_v18 = vadd.f32 %v1949_v26, %v1948_v51  ;;  %v1546_v40 = vadd.f32 %v3165_v37, %v1507_v56  ;;  %v1508_v14 = vmul.f32 %v2230_v4, %v3197_v62  ;;  %v1561_v56 = vld [vmem:[%s2511_s30 + $0x38] sm:$0xff] }
 0x47f   : > { %v1921_v61 = vpop.f32.mrb[60].mxu0  ;;  %1605 = vxpose.xlu1.b32.cont [3/16] (narrow) %v1538_v32, 64  ;;  %v1539_v9 = vadd.f32 %v3165_v37, %v1500_v24  ;;  %v2232_v43 = vpop.eup %2231 }
 0x480   : > { %v1922_v55 = vpop.f32.mrb[61].mxu0  ;;  %v1239_v39 = vpop.xlane.xlu1 %1238  ;;  %v1547_v51 = vadd.f32 %v3165_v37, %v1508_v14  ;;  %v1509_v32 = vmul.f32 %v2232_v43, %v3201_v41  ;;  %v1563_v14 = vld [vmem:[%s2511_s30 + $0x48] sm:$0xff] }
 0x481   : > { %v1923_v11 = vadd.f32 %v1922_v55, %v1921_v61  ;;  %v1924_v31 = vpop.f32.mrb[62].mxu0  ;;  %2237 = vrcp.f32 %v1239_v39 }
 0x482   : > { %v1925_v60 = vpop.f32.mrb[63].mxu0  ;;  %v1951_v34 = vpop.f32.mrb[72].mxu1  ;;  %v1548_v24 = vadd.f32 %v3165_v37, %v1509_v32  ;;  %v1565_v32 = vld [vmem:[%s2511_s30 + $0x58] sm:$0xff] }
 0x483   : > { %v1501_v3 = vmul.f32 %v2216_v48, %v1923_v11  ;;  %v1926_v15 = vadd.f32 %v1925_v60, %v1924_v31  ;;  %1606 = vxpose.xlu1.b32.cont [4/16] (narrow) %v1539_v9, 64  ;;  %v1952_v45 = vpop.f32.mrb[73].mxu1  ;;  %v2234_v27 = vpop.eup %2233  ;;  %v1554_v31 = vld [vmem:[%s2511_s30] sm:$0xff] }
 0x484   : > { %v3207_v2 = vadd.f32 %v1952_v45, %v1951_v34  ;;  %v1954_v63 = vpop.f32.mrb[74].mxu1  ;;  %v1510_v26 = vmul.f32 %v2234_v27, %v3204_v18  ;;  %v3229_v18 = vstv %s1570_s10 }
 0x485   : > { %v1540_v35 = vadd.f32 %v3165_v37, %v1501_v3  ;;  %v1502_v30 = vmul.f32 %v2218_v44, %v1926_v15  ;;  %v1955_v53 = vpop.f32.mrb[75].mxu1  ;;  %v1556_v3 = vld [vmem:[%s2511_s30 + $0x10] sm:$0xff]  ;;  %v1558_v44 = vld [vmem:[%s2511_s30 + $0x20] sm:$0xff] }
 0x486   : > { %v3210_v22 = vadd.f32 %v1955_v53, %v1954_v63  ;;  %v1549_v62 = vadd.f32 %v3165_v37, %v1510_v26 }
 0x487   : > { %v1927_v21 = vpop.f32.mrb[64].mxu0  ;;  %1607 = vxpose.xlu1.b32.cont [5/16] (narrow) %v1540_v35, 64  ;;  %v1541_v23 = vadd.f32 %v3165_v37, %v1502_v30  ;;  %v2236_v61 = vpop.eup %2235  ;;  %v1560_v30 = vld [vmem:[%s2511_s30 + $0x30] sm:$0xff] }
 0x488   : > { %v1928_v25 = vpop.f32.mrb[65].mxu0  ;;  %v1511_v55 = vmul.f32 %v2236_v61, %v3207_v2  ;;  %v1567_v61 = vld [vmem:[%s2511_s30 + $0x68] sm:$0xff] }
 0x489   : > { %v1929_v5 = vadd.f32 %v1928_v25, %v1927_v21  ;;  %v1930_v20 = vpop.f32.mrb[66].mxu0  ;;  %v1562_v21 = vld [vmem:[%s2511_s30 + $0x40] sm:$0xff] }
 0x48a   : > { %v1931_v7 = vpop.f32.mrb[67].mxu0  ;;  %v1550_v41 = vadd.f32 %v3165_v37, %v1511_v55 }
 0x48b   : > { %v1503_v8 = vmul.f32 %v2220_v12, %v1929_v5  ;;  %v1932_v50 = vadd.f32 %v1931_v7, %v1930_v20  ;;  %1608 = vxpose.xlu1.b32.cont [6/16] (narrow) %v1541_v23, 64  ;;  %v2238_v49 = vpop.eup %2237  ;;  %v1564_v20 = vld [vmem:[%s2511_s30 + $0x50] sm:$0xff] }
 0x48c   : > { %v1512_v9 = vmul.f32 %v2238_v49, %v3210_v22 }
 0x48d   : > { %v1542_v6 = vadd.f32 %v3165_v37, %v1503_v8  ;;  %v1504_v58 = vmul.f32 %v2222_v1, %v1932_v50  ;;  %v1566_v50 = vld [vmem:[%s2511_s30 + $0x60] sm:$0xff] }
 0x48e   : > { %v1551_v11 = vadd.f32 %v3165_v37, %v1512_v9 }
 0x48f   : > { %v1933_v16 = vpop.f32.mrb[68].mxu0  ;;  %1609 = vxpose.xlu1.b32.cont [7/16] (narrow) %v1542_v6, 64  ;;  %v1543_v46 = vadd.f32 %v3165_v37, %v1504_v58  ;;  %v1568_v58 = vld [vmem:[%s2511_s30 + $0x70] sm:$0xff] }
 0x490   : > { %v1934_v59 = vpop.f32.mrb[69].mxu0 }
 0x491   : > { %v1935_v42 = vadd.f32 %v1934_v59, %v1933_v16  ;;  %v1936_v38 = vpop.f32.mrb[70].mxu0 }
 0x492   : > { %v1937_v47 = vpop.f32.mrb[71].mxu0 }
 0x493   : > { %v1505_v28 = vmul.f32 %v2224_v29, %v1935_v42  ;;  %v1938_v33 = vadd.f32 %v1937_v47, %v1936_v38  ;;  %1610 = vxpose.xlu1.b32.cont [8/16] (narrow) %v1543_v46, 64  ;;  %v1555_v42 = vld [vmem:[%s2511_s30 + $0x8] sm:$0xff] }
 0x495   : > { %v1544_v10 = vadd.f32 %v3165_v37, %v1505_v28  ;;  %v1506_v19 = vmul.f32 %v2226_v52, %v1938_v33 }
 0x497   : > { %1611 = vxpose.xlu1.b32.cont [9/16] (narrow) %v1544_v10, 64  ;;  %v1545_v57 = vadd.f32 %v3165_v37, %v1506_v19  ;;  %v1559_v10 = vld [vmem:[%s2511_s30 + $0x28] sm:$0xff] }
 0x49b   : > { %1612 = vxpose.xlu1.b32.cont [10/16] (narrow) %v1545_v57, 64 }
 0x49f   : > { %1613 = vxpose.xlu1.b32.cont [11/16] (narrow) %v1546_v40, 64 }
 0x4a3   : > { %1614 = vxpose.xlu1.b32.cont [12/16] (narrow) %v1547_v51, 64 }
 0x4a7   : > { %1615 = vxpose.xlu1.b32.cont [13/16] (narrow) %v1548_v24, 64 }
 0x4ab   : > { %1616 = vxpose.xlu1.b32.cont [14/16] (narrow) %v1549_v62, 64 }
 0x4af   : > { %1617 = vxpose.xlu1.b32.cont [15/16] (narrow) %v1550_v41, 64  ;;  %v1569_v41 = vld [vmem:[%s2511_s30 + $0x78] sm:$0xff]  ;;  %s2357_s30 = smov [#allocation9]  }
 0x4b0   : > { %s2273_s6 = sshll.u32 %s2357_s30, 4  ;;  %s2274_s6 = int_to_ptr.vmem [resolvable:$false] %s2273_s6 }
 0x4b1   : > { %s2275_s15 = scalar_lea.vmem %s2274_s6, 4096  ;;  %p2276_p6 = scmp.lt.s32.totalorder %s3289_s13, %s2274_s6 }
 0x4b2   : > { %p2277_p13 = scmp.lt.s32.totalorder %s2275_s15, %s2269_s23 }
 0x4b3   : > { %1618 = vxpose.xlu1.b32.end [16/16] (narrow) %v1551_v11, 64 }
 0x4b4   : > { %p2278_p2 = por %p2277_p13, %p2276_p6 }
 0x4b6   : > { %p2279_p5 = pnand %p2278_p2, %p2272_p0 }
 0x4b7   : > { %v1587_v48 = vpop.trf.xlu0 }
 0x4b8   : > { %v1636_v60 = vmul.f32 %v3229_v18, %v1587_v48 }
 0x4ba   : > { %v1652_v34 = vadd.f32 %v1636_v60, %v1554_v31 }
 0x4bb   : > { %v1588_v15 = vpop.trf.xlu0 }
 0x4bc   : > { %1668 = vst [vmem:[%s3236_s12] sm:$0xff] %v1652_v34  ;;  %v1638_v37 = vmul.f32 %v3229_v18, %v1588_v15 }
 0x4be   : > { %v1654_v45 = vadd.f32 %v1638_v37, %v1556_v3 }
 0x4bf   : > { %v1589_v2 = vpop.trf.xlu0 }
 0x4c0   : > { %1670 = vst [vmem:[%s3236_s12 + $0x10] sm:$0xff] %v1654_v45  ;;  %v1640_v63 = vmul.f32 %v3229_v18, %v1589_v2 }
 0x4c2   : > { %v1656_v35 = vadd.f32 %v1640_v63, %v1558_v44 }
 0x4c3   : > { %v1590_v53 = vpop.trf.xlu0 }
 0x4c4   : > { %1672 = vst [vmem:[%s3236_s12 + $0x20] sm:$0xff] %v1656_v35  ;;  %v1642_v22 = vmul.f32 %v3229_v18, %v1590_v53 }
 0x4c6   : > { %v1658_v17 = vadd.f32 %v1642_v22, %v1560_v30 }
 0x4c7   : > { %v1591_v25 = vpop.trf.xlu0 }
 0x4c8   : > { %1674 = vst [vmem:[%s3236_s12 + $0x30] sm:$0xff] %v1658_v17  ;;  %v1644_v23 = vmul.f32 %v3229_v18, %v1591_v25 }
 0x4ca   : > { %v1660_v5 = vadd.f32 %v1644_v23, %v1562_v21 }
 0x4cb   : > { %v1592_v12 = vpop.trf.xlu0 }
 0x4cc   : > { %1676 = vst [vmem:[%s3236_s12 + $0x40] sm:$0xff] %v1660_v5  ;;  %v1646_v7 = vmul.f32 %v3229_v18, %v1592_v12 }
 0x4ce   : > { %v1662_v8 = vadd.f32 %v1646_v7, %v1564_v20 }
 0x4cf   : > { %v1593_v1 = vpop.trf.xlu0 }
 0x4d0   : > { %1678 = vst [vmem:[%s3236_s12 + $0x50] sm:$0xff] %v1662_v8  ;;  %v1648_v36 = vmul.f32 %v3229_v18, %v1593_v1 }
 0x4d2   : > { %v1664_v6 = vadd.f32 %v1648_v36, %v1566_v50 }
 0x4d3   : > { %v1594_v16 = vpop.trf.xlu0 }
 0x4d4   : > { %1680 = vst [vmem:[%s3236_s12 + $0x60] sm:$0xff] %v1664_v6  ;;  %v1650_v59 = vmul.f32 %v3229_v18, %v1594_v16 }
 0x4d6   : > { %v1666_v46 = vadd.f32 %v1650_v59, %v1568_v58 }
 0x4d8   : > { %1682 = vst [vmem:[%s3236_s12 + $0x70] sm:$0xff] %v1666_v46 }
 0x4f7   : > { %v1619_v38 = vpop.trf.xlu1 }
 0x4f8   : > { %v1637_v29 = vmul.f32 %v3229_v18, %v1619_v38 }
 0x4fa   : > { %v1653_v47 = vadd.f32 %v1637_v29, %v1555_v42 }
 0x4fb   : > { %v1620_v28 = vpop.trf.xlu1 }
 0x4fc   : > { %1669 = vst [vmem:[%s3236_s12 + $0x8] sm:$0xff] %v1653_v47  ;;  %v1639_v33 = vmul.f32 %v3229_v18, %v1620_v28 }
 0x4fe   : > { %v1655_v52 = vadd.f32 %v1639_v33, %v1557_v0 }
 0x4ff   : > { %v1621_v19 = vpop.trf.xlu1 }
 0x500   : > { %1671 = vst [vmem:[%s3236_s12 + $0x18] sm:$0xff] %v1655_v52  ;;  %v1641_v54 = vmul.f32 %v3229_v18, %v1621_v19 }
 0x502   : > { %v1657_v13 = vadd.f32 %v1641_v54, %v1559_v10 }
 0x503   : > { %v1622_v57 = vpop.trf.xlu1 }
 0x504   : > { %1673 = vst [vmem:[%s3236_s12 + $0x28] sm:$0xff] %v1657_v13  ;;  %v1643_v4 = vmul.f32 %v3229_v18, %v1622_v57 }
 0x506   : > { %v1659_v40 = vadd.f32 %v1643_v4, %v1561_v56 }
 0x507   : > { %v1623_v39 = vpop.trf.xlu1 }
 0x508   : > { %1675 = vst [vmem:[%s3236_s12 + $0x38] sm:$0xff] %v1659_v40  ;;  %v1645_v43 = vmul.f32 %v3229_v18, %v1623_v39 }
 0x50a   : > { %v1661_v51 = vadd.f32 %v1645_v43, %v1563_v14 }
 0x50b   : > { %v1624_v27 = vpop.trf.xlu1 }
 0x50c   : > { %1677 = vst [vmem:[%s3236_s12 + $0x48] sm:$0xff] %v1661_v51  ;;  %v1647_v24 = vmul.f32 %v3229_v18, %v1624_v27 }
 0x50e   : > { %v1663_v26 = vadd.f32 %v1647_v24, %v1565_v32 }
 0x50f   : > { %v1625_v62 = vpop.trf.xlu1 }
 0x510   : > { %1679 = vst [vmem:[%s3236_s12 + $0x58] sm:$0xff] %v1663_v26  ;;  %v1649_v55 = vmul.f32 %v3229_v18, %v1625_v62 }
 0x512   : > { %v1665_v49 = vadd.f32 %v1649_v55, %v1567_v61 }
 0x513   : > { %v1626_v9 = vpop.trf.xlu1 }
 0x514   : > { %1681 = vst [vmem:[%s3236_s12 + $0x68] sm:$0xff] %v1665_v49  ;;  %v1651_v11 = vmul.f32 %v3229_v18, %v1626_v9 }
 0x516   : > { %v1667_v31 = vadd.f32 %v1651_v11, %v1569_v41 }
 0x518   : > { %1683 = vst [vmem:[%s3236_s12 + $0x78] sm:$0xff] %v1667_v31 }
 0x519   : > { %2282 = shalt.err (!%p2279_p5)
}
 0x51a   : > { %s2283_s17 = scalar_lea.hbm %s3287_s4, 2048  ;;  %s2287_s11 = scalar_lea.hbm %s3344_s5, 4096 }
 0x51b   : > { %p2284_p4 = scmp.ne.s32.totalorder %s3287_s4, %s2283_s17  ;;  %p2288_p12 = scmp.lt.u32.totalorder %s3287_s4, %s3344_s5 }
 0x51c   : > { %p2289_p1 = scmp.lt.u32.totalorder %s2287_s11, %s2283_s17  ;;  %p2291_p8 = scmp.lt.u32.totalorder %s2283_s17, %s3287_s4 }
 0x51d   : > { %p2285_p7 = pnand %p2284_p4, %p3414_p9 }
 0x51e   : > { %p2290_p3 = por %p2289_p1, %p2288_p12 }
 0x51f   : > { %p2286_p10 = pneg %p2285_p7 }
 0x520   : > { %p2292_p11 = por %p2291_p8, %p2290_p3 }
 0x522   : > { %p2293_p0 = pnand %p2292_p11, %p2286_p10 }
 0x524   : > { %2296 = shalt.err (!%p2293_p0)
}
 0x525   : > { %s2358_s28 = smov 256   ;;  %s2359_s14 = smov 16  }
 0x526   : > { %1975 = dma.vmem_to_hbm [thread:$0]  (%p3414_p9), %s3289_s13, 2048, %s3287_s4, %s1685_s29, %s2358_s28, %s2358_s28, %s2359_s14  }
 0x527 PF: > { %s1715_s16 = sand.u32 1, %s2331_s20   ;;  %p3415_p6 = scmp.ne.s32.totalorder %s3366_s9, 0 }
 0x528   : > { %p3416_p13 = scmp.ge.s32.totalorder %s2351_s25, 2  ;;  %s1716_s23 = scalar_lea.sflag [#allocation8], %s1715_s16 }
 0x52a   : > { %p1982_p2 = pnand %p3416_p13, %p3415_p6 }
 0x52c   : > { %2326 = dma.done.wait (!%p1982_p2), %s1716_s23, 2048  }
 0x52d   : > { %2328 = vsyncadd (!%p1982_p2), %s1716_s23, 4294965248  ;;  %s22_s25 = sadd.s32 1, %s2351_s25   ;;  %s3417_s20 = smov %s2335_s21 }
 0x52e   : > { %p19_p5 = scmp.ge.s32.totalorder %s22_s25, 4   ;;  %s3418_s21 = smov %s2339_s22 }
 0x52f   : > { %s3419_s22 = smov %s2449_s8  ;;  %s3420_s23 = smov %s2347_s24 }
 0x530   : > { %s3421_s24 = smov %s3423_s27  ;;  %21 = sbr.rel (!%p19_p5) target bundleno = 8 (0x8), region = 91 }
 0x537   :  { %1721 = vsyncpa [#allocation7], 1 }
 0x538   :  { %1723 = vsyncpa [#allocation7 + $0x1], 1 }
 0x539   :  { %1724 = vsyncpa [#allocation8], 1 }
 0x53a   :  { %1726 = vsyncpa [#allocation8 + $0x1], 1 }

</bundles_post_ra>
